<compile_context>
chip_gen: v7x
topology: tpu7x:2x2x1
jax: 0.10.0
libtpu: 0.0.40
codegen_flags: <defaults>
</compile_context>

<pallas_src>
import math
from functools import partial

import jax
import jax.numpy as jnp
from jax.experimental import pallas as pl
from jax.experimental.pallas import tpu as pltpu


MASK_VALUE = -1e30
VMEM_LIMIT_BYTES = 32 * 1024 * 1024  # explicit scoped-VMEM limit (safe on v5e/v6e/v7x)


# --------------------------------------------------------------------------
# Linear: o = x @ W + b   (W pre-transposed to (in, out), pre-cast to bf16)
# --------------------------------------------------------------------------

def _linear_kernel(x_ref, w_ref, b_ref, o_ref):
    # bf16 MXU matmul with f32 accumulation; bias add in f32.
    x = x_ref[...].astype(jnp.bfloat16)
    acc = jnp.dot(x, w_ref[...], preferred_element_type=jnp.float32)
    o_ref[...] = (acc + b_ref[...]).astype(o_ref.dtype)


def linear(x, w, b, *, tm=128, out_dtype=None):
    """x: (M, K). w: (K, N) bf16 (pre-transposed). b: (1, N) f32. Returns (M, N)."""
    M, K = x.shape
    Kw, N = w.shape
    assert K == Kw
    out_dtype = out_dtype if out_dtype is not None else x.dtype

    nm = pl.cdiv(M, tm)
    Mp = nm * tm
    if Mp != M:  # ragged tail: pad rows, slice after
        x = jnp.pad(x, ((0, Mp - M), (0, 0)))

    out = pl.pallas_call(
        _linear_kernel,
        out_shape=jax.ShapeDtypeStruct((Mp, N), out_dtype),
        grid_spec=pltpu.PrefetchScalarGridSpec(
            num_scalar_prefetch=0,
            grid=(nm,),
            in_specs=[
                pl.BlockSpec((tm, K), lambda i: (i, 0)),   # x rows (lane-dense)
                # NOTE: at real GPT-2 widths on v7x, add pipeline_mode=pl.Buffered(1)
                # (constant index_map -> single-buffer the resident weights).
                pl.BlockSpec((K, N), lambda i: (0, 0)),    # full weight slab
                pl.BlockSpec((1, N), lambda i: (0, 0)),    # bias
            ],
            out_specs=pl.BlockSpec((tm, N), lambda i: (i, 0)),
        ),
        compiler_params=pltpu.CompilerParams(
            dimension_semantics=("parallel",),
            vmem_limit_bytes=VMEM_LIMIT_BYTES,
        ),
    )(x, w, b)
    return out[:M] if Mp != M else out


# --------------------------------------------------------------------------
# Causal flash attention over (B*H, T, head_dim)
# --------------------------------------------------------------------------

def _flash_causal_kernel(q_ref, k_ref, v_ref, o_ref, m_sc, l_sc, acc_sc, *, scale):
    qi = pl.program_id(1)
    ki = pl.program_id(2)
    tq = q_ref.shape[1]
    tk = k_ref.shape[1]

    @pl.when(ki == 0)
    def _init():
        m_sc[...] = jnp.full_like(m_sc, MASK_VALUE)
        l_sc[...] = jnp.zeros_like(l_sc)
        acc_sc[...] = jnp.zeros_like(acc_sc)

    # With tq == tk, blocks strictly above the diagonal are fully masked -> skip.
    @pl.when(ki <= qi)
    def _compute():
        q = q_ref[0]   # (tq, hd) bf16
        k = k_ref[0]   # (tk, hd) bf16
        v = v_ref[0]   # (tk, hd) bf16

        s = jnp.einsum("qd,kd->qk", q, k,
                       preferred_element_type=jnp.float32) * scale      # (tq, tk) f32
        row = qi * tq + jax.lax.broadcasted_iota(jnp.int32, (tq, tk), 0)
        col = ki * tk + jax.lax.broadcasted_iota(jnp.int32, (tq, tk), 1)
        s = jnp.where(row >= col, s, MASK_VALUE)

        m_prev = m_sc[...]
        m_new = jnp.maximum(m_prev, jnp.max(s, axis=-1, keepdims=True))
        alpha = jnp.exp(m_prev - m_new)
        p = jnp.exp(s - m_new)
        l_sc[...] = alpha * l_sc[...] + jnp.sum(p, axis=-1, keepdims=True)
        acc_sc[...] = alpha * acc_sc[...] + jnp.dot(
            p.astype(v.dtype), v, preferred_element_type=jnp.float32)
        m_sc[...] = m_new

    @pl.when(ki == pl.num_programs(2) - 1)
    def _finalize():
        inv_l = pl.reciprocal(l_sc[...], approx=True)
        o_ref[0] = (acc_sc[...] * inv_l).astype(o_ref.dtype)


def flash_causal_attention(q, k, v, *, tq=128, tk=128):
    """q, k, v: (BH, T, hd) bf16. Returns (BH, T, hd) in q.dtype."""
    assert tq == tk, "causal block-skip logic assumes square tiles"
    BH, T, hd = q.shape
    scale = 1.0 / math.sqrt(hd)

    nq = pl.cdiv(T, tq)
    Tp = nq * tq
    if Tp != T:  # zero-pad sequence; causal mask keeps padded keys out of real rows
        pad = ((0, 0), (0, Tp - T), (0, 0))
        q = jnp.pad(q, pad)
        k = jnp.pad(k, pad)
        v = jnp.pad(v, pad)
    nk = Tp // tk

    out = pl.pallas_call(
        partial(_flash_causal_kernel, scale=scale),
        out_shape=jax.ShapeDtypeStruct((BH, Tp, hd), q.dtype),
        grid_spec=pltpu.PrefetchScalarGridSpec(
            num_scalar_prefetch=0,
            grid=(BH, nq, nk),
            in_specs=[
                pl.BlockSpec((1, tq, hd), lambda b, i, j: (b, i, 0)),  # Q
                pl.BlockSpec((1, tk, hd), lambda b, i, j: (b, j, 0)),  # K
                pl.BlockSpec((1, tk, hd), lambda b, i, j: (b, j, 0)),  # V
            ],
            out_specs=pl.BlockSpec((1, tq, hd), lambda b, i, j: (b, i, 0)),
            scratch_shapes=[
                pltpu.VMEM((tq, 1), jnp.float32),    # running max m
                pltpu.VMEM((tq, 1), jnp.float32),    # running denom l
                pltpu.VMEM((tq, hd), jnp.float32),   # output accumulator
            ],
        ),
        compiler_params=pltpu.CompilerParams(
            dimension_semantics=("parallel", "parallel", "arbitrary"),
            vmem_limit_bytes=VMEM_LIMIT_BYTES,
        ),
    )(q, k, v)
    return out[:, :T] if Tp != T else out


# --------------------------------------------------------------------------
# Full CausalSelfAttention forward
# --------------------------------------------------------------------------

def causal_self_attention_forward(x, w_attn_t, b_attn, w_proj_t, b_proj, n_head,
                                  *, tm=128, tq=128):
    """x: (B, T, D) f32.
    w_attn_t: (D, 3D) bf16 (pre-transposed c_attn weight), b_attn: (3D,) f32.
    w_proj_t: (D, D)  bf16 (pre-transposed c_proj weight), b_proj: (D,) f32.
    """
    B, T, D = x.shape
    assert D % n_head == 0
    hd = D // n_head

    x2 = x.reshape(B * T, D)
    # c_attn: output bf16 so the attention kernel reads bf16 directly.
    qkv = linear(x2, w_attn_t, b_attn.reshape(1, -1).astype(jnp.float32),
                 tm=tm, out_dtype=jnp.bfloat16)

    q, k, v = jnp.split(qkv, 3, axis=-1)

    def to_heads(t):  # (B*T, D) -> (B*n_head, T, hd)
        return (t.reshape(B, T, n_head, hd)
                 .transpose(0, 2, 1, 3)
                 .reshape(B * n_head, T, hd))

    y = flash_causal_attention(to_heads(q), to_heads(k), to_heads(v), tq=tq, tk=tq)

    y = (y.reshape(B, n_head, T, hd)
          .transpose(0, 2, 1, 3)
          .reshape(B * T, D))

    out = linear(y, w_proj_t, b_proj.reshape(1, -1).astype(jnp.float32),
                 tm=tm, out_dtype=x.dtype)
    return out.reshape(B, T, D)


# --------------------------------------------------------------------------
# Pure-JAX f32 reference (mirrors the PyTorch module)
# --------------------------------------------------------------------------

def causal_self_attention_reference(x, w_attn, b_attn, w_proj, b_proj, n_head):
    B, T, D = x.shape
    hd = D // n_head
    qkv = x @ w_attn.T + b_attn
    q, k, v = jnp.split(qkv, 3, axis=-1)
    q = q.reshape(B, T, n_head, hd).transpose(0, 2, 1, 3)
    k = k.reshape(B, T, n_head, hd).transpose(0, 2, 1, 3)
    v = v.reshape(B, T, n_head, hd).transpose(0, 2, 1, 3)
    s = jnp.einsum("bhqd,bhkd->bhqk", q, k) / math.sqrt(hd)
    mask = jnp.tril(jnp.ones((T, T), dtype=bool))
    s = jnp.where(mask[None, None], s, -jnp.inf)
    p = jax.nn.softmax(s, axis=-1)
    y = jnp.einsum("bhqk,bhkd->bhqd", p, v)
    y = y.transpose(0, 2, 1, 3).reshape(B, T, D)
    return y @ w_proj.T + b_proj


if __name__ == "__main__":
    # Small but lane-dense config: n_embd = 128 (multiple of 128), T = 256 so the
    # attention grid has 2 query blocks x 2 kv blocks (exercises causal block skip).
    B, T, n_head, n_embd = 2, 256, 4, 128

    key = jax.random.PRNGKey(0)
    kx, k1, k2, k3, k4 = jax.random.split(key, 5)

    x = jax.random.normal(kx, (B, T, n_embd), dtype=jnp.float32)
    bound = 1.0 / math.sqrt(n_embd)
    w_attn = jax.random.uniform(k1, (3 * n_embd, n_embd), jnp.float32, -bound, bound)
    b_attn = jax.random.uniform(k2, (3 * n_embd,), jnp.float32, -bound, bound)
    w_proj = jax.random.uniform(k3, (n_embd, n_embd), jnp.float32, -bound, bound)
    b_proj = jax.random.uniform(k4, (n_embd,), jnp.float32, -bound, bound)

    # One-time weight prep (model init time, NOT the per-call path):
    # torch nn.Linear stores (out, in) -> transpose to (in, out), cast to bf16.
    w_attn_t = jnp.asarray(w_attn.T, dtype=jnp.bfloat16)
    w_proj_t = jnp.asarray(w_proj.T, dtype=jnp.bfloat16)

    fwd = jax.jit(partial(causal_self_attention_forward, n_head=n_head))
    out = fwd(x, w_attn_t, b_attn, w_proj_t, b_proj)
    out = jax.block_until_ready(out)

    ref = causal_self_attention_reference(x, w_attn, b_attn, w_proj, b_proj, n_head)
    assert out.shape == (B, T, n_embd)
    assert out.dtype == x.dtype
    # bf16 matmuls with f32 accumulation -> loosened tolerance vs the f32 reference.
    assert jnp.allclose(out, ref, atol=5e-2, rtol=5e-2), "mismatch vs reference"

    print("KERNEL_OK")
</pallas_src>

<mosaic_0001>
module attributes {stable_mosaic.version = 11 : i64} {
  func.func @_linear_kernel(%arg0: i32, %arg1: memref<128x128xf32, #tpu.memory_space<vmem>>, %arg2: memref<128x384xbf16, #tpu.memory_space<vmem>>, %arg3: memref<1x384xf32, #tpu.memory_space<vmem>>, %arg4: memref<128x384xbf16, #tpu.memory_space<vmem>>) attributes {dimension_semantics = [#tpu.dimension_semantics<parallel>], iteration_bounds = array<i64: 4>, scalar_prefetch = 0 : i64, scratch_operands = 0 : i64, tpu.core_type = #tpu.core_type<tc>, window_params = [{transform_indices = @transform_0, window_bounds = array<i64: 128, 128>}, {pipeline_mode = #tpu.pipeline_mode<synchronous>, transform_indices = @transform_1, window_bounds = array<i64: 128, 384>}, {pipeline_mode = #tpu.pipeline_mode<synchronous>, transform_indices = @transform_2, window_bounds = array<i64: 1, 384>}, {transform_indices = @transform_3, window_bounds = array<i64: 128, 384>}]} {
    %c0 = arith.constant 0 : index
    %c0_0 = arith.constant 0 : index
    %0 = vector.load %arg1[%c0, %c0_0] : memref<128x128xf32, #tpu.memory_space<vmem>>, vector<128x128xf32>
    %1 = arith.truncf %0 : vector<128x128xf32> to vector<128x128xbf16>
    %c0_1 = arith.constant 0 : index
    %c0_2 = arith.constant 0 : index
    %2 = vector.load %arg2[%c0_1, %c0_2] : memref<128x384xbf16, #tpu.memory_space<vmem>>, vector<128x384xbf16>
    %cst = arith.constant dense<0.000000e+00> : vector<128x384xf32>
    %3 = tpu.matmul %1, %2, %cst {dimension_numbers = #tpu.dot_dimension_numbers<[1], [0], [0], [1], [0, 0, 1, 1], [], []>} : vector<128x128xbf16>, vector<128x384xbf16>, vector<128x384xf32> -> vector<128x384xf32>
    %c0_3 = arith.constant 0 : index
    %c0_4 = arith.constant 0 : index
    %4 = vector.load %arg3[%c0_3, %c0_4] : memref<1x384xf32, #tpu.memory_space<vmem>>, vector<1x384xf32>
    %5 = vector.broadcast %4 : vector<1x384xf32> to vector<128x384xf32>
    %6 = arith.addf %3, %5 : vector<128x384xf32>
    %7 = arith.truncf %6 : vector<128x384xf32> to vector<128x384xbf16>
    %c0_5 = arith.constant 0 : index
    %c0_6 = arith.constant 0 : index
    %8 = vector.load %arg4[%c0_5, %c0_6] : memref<128x384xbf16, #tpu.memory_space<vmem>>, vector<128x384xbf16>
    tpu.vector_store %arg4[%c0_5, %c0_6], %7 {strides = array<i32>} : memref<128x384xbf16, #tpu.memory_space<vmem>>, vector<128x384xbf16>,
    return
  }
  func.func @transform_0(%arg0: i32) -> (i32, i32) {
    %c0_i32 = arith.constant 0 : i32
    %c0_i32_0 = arith.constant 0 : i32
    return %arg0, %c0_i32 : i32, i32
  }
  func.func @transform_1(%arg0: i32) -> (i32, i32) {
    %c0_i32 = arith.constant 0 : i32
    %c0_i32_0 = arith.constant 0 : i32
    %c0_i32_1 = arith.constant 0 : i32
    return %c0_i32, %c0_i32_0 : i32, i32
  }
  func.func @transform_2(%arg0: i32) -> (i32, i32) {
    %c0_i32 = arith.constant 0 : i32
    %c0_i32_0 = arith.constant 0 : i32
    %c0_i32_1 = arith.constant 0 : i32
    return %c0_i32, %c0_i32_0 : i32, i32
  }
  func.func @transform_3(%arg0: i32) -> (i32, i32) {
    %c0_i32 = arith.constant 0 : i32
    %c0_i32_0 = arith.constant 0 : i32
    return %arg0, %c0_i32 : i32, i32
  }
}

module attributes {stable_mosaic.version = 11 : i64} {
  func.func @_flash_causal_kernel(%arg0: i32, %arg1: i32, %arg2: i32, %arg3: memref<1x128x32xbf16, #tpu.memory_space<vmem>>, %arg4: memref<1x128x32xbf16, #tpu.memory_space<vmem>>, %arg5: memref<1x128x32xbf16, #tpu.memory_space<vmem>>, %arg6: memref<1x128x32xbf16, #tpu.memory_space<vmem>>, %arg7: memref<128x1xf32, #tpu.memory_space<vmem>>, %arg8: memref<128x1xf32, #tpu.memory_space<vmem>>, %arg9: memref<128x32xf32, #tpu.memory_space<vmem>>) attributes {dimension_semantics = [#tpu.dimension_semantics<parallel>, #tpu.dimension_semantics<parallel>, #tpu.dimension_semantics<arbitrary>], iteration_bounds = array<i64: 8, 2, 2>, scalar_prefetch = 0 : i64, scratch_operands = 3 : i64, tpu.core_type = #tpu.core_type<tc>, window_params = [{transform_indices = @transform_0, window_bounds = array<i64: 1, 128, 32>}, {transform_indices = @transform_1, window_bounds = array<i64: 1, 128, 32>}, {transform_indices = @transform_2, window_bounds = array<i64: 1, 128, 32>}, {transform_indices = @transform_3, window_bounds = array<i64: 1, 128, 32>}]} {
    %c0_i32 = arith.constant 0 : i32
    %0 = arith.cmpi eq, %arg2, %c0_i32 : i32
    %1 = arith.extui %0 : i1 to i32
    %c0_i32_0 = arith.constant 0 : i32
    %2 = arith.cmpi ne, %1, %c0_i32_0 : i32
    scf.if %2 {
      %cst = arith.constant -1.000000e+30 : f32
      %9 = vector.broadcast %cst : f32 to vector<128x1xf32>
      %c0 = arith.constant 0 : index
      %c0_3 = arith.constant 0 : index
      %10 = vector.load %arg7[%c0, %c0_3] : memref<128x1xf32, #tpu.memory_space<vmem>>, vector<128x1xf32>
      tpu.vector_store %arg7[%c0, %c0_3], %9 {strides = array<i32>} : memref<128x1xf32, #tpu.memory_space<vmem>>, vector<128x1xf32>,
      %cst_4 = arith.constant 0.000000e+00 : f32
      %11 = vector.broadcast %cst_4 : f32 to vector<128x1xf32>
      %c0_5 = arith.constant 0 : index
      %c0_6 = arith.constant 0 : index
      %12 = vector.load %arg8[%c0_5, %c0_6] : memref<128x1xf32, #tpu.memory_space<vmem>>, vector<128x1xf32>
      tpu.vector_store %arg8[%c0_5, %c0_6], %11 {strides = array<i32>} : memref<128x1xf32, #tpu.memory_space<vmem>>, vector<128x1xf32>,
      %cst_7 = arith.constant 0.000000e+00 : f32
      %13 = vector.broadcast %cst_7 : f32 to vector<128x32xf32>
      %c0_8 = arith.constant 0 : index
      %c0_9 = arith.constant 0 : index
      %14 = vector.load %arg9[%c0_8, %c0_9] : memref<128x32xf32, #tpu.memory_space<vmem>>, vector<128x32xf32>
      tpu.vector_store %arg9[%c0_8, %c0_9], %13 {strides = array<i32>} : memref<128x32xf32, #tpu.memory_space<vmem>>, vector<128x32xf32>,
    } else {
    }
    %3 = arith.cmpi sle, %arg2, %arg1 : i32
    %4 = arith.extui %3 : i1 to i32
    %c0_i32_1 = arith.constant 0 : i32
    %5 = arith.cmpi ne, %4, %c0_i32_1 : i32
    scf.if %5 {
      %c0 = arith.constant 0 : index
      %c0_3 = arith.constant 0 : index
      %c0_4 = arith.constant 0 : index
      %9 = vector.load %arg3[%c0, %c0_3, %c0_4] : memref<1x128x32xbf16, #tpu.memory_space<vmem>>, vector<1x128x32xbf16>
      %10 = vector.shape_cast %9 : vector<1x128x32xbf16> to vector<128x32xbf16>
      %c0_5 = arith.constant 0 : index
      %c0_6 = arith.constant 0 : index
      %c0_7 = arith.constant 0 : index
      %11 = vector.load %arg4[%c0_5, %c0_6, %c0_7] : memref<1x128x32xbf16, #tpu.memory_space<vmem>>, vector<1x128x32xbf16>
      %12 = vector.shape_cast %11 : vector<1x128x32xbf16> to vector<128x32xbf16>
      %c0_8 = arith.constant 0 : index
      %c0_9 = arith.constant 0 : index
      %c0_10 = arith.constant 0 : index
      %13 = vector.load %arg5[%c0_8, %c0_9, %c0_10] : memref<1x128x32xbf16, #tpu.memory_space<vmem>>, vector<1x128x32xbf16>
      %14 = vector.shape_cast %13 : vector<1x128x32xbf16> to vector<128x32xbf16>
      "tpu.trace_start"() <{level = 10 : i32, message = "qd,kd->qk"}> : () -> ()
      %cst = arith.constant dense<0.000000e+00> : vector<128x128xf32>
      %15 = tpu.matmul %10, %12, %cst {dimension_numbers = #tpu.dot_dimension_numbers<[1], [1], [0], [0], [0, 0, 1, 0], [], []>} : vector<128x32xbf16>, vector<128x32xbf16>, vector<128x128xf32> -> vector<128x128xf32>
      "tpu.trace_stop"() : () -> ()
      %cst_11 = arith.constant 0.176776692 : f32
      %16 = vector.broadcast %cst_11 : f32 to vector<128x128xf32>
      %17 = arith.mulf %15, %16 : vector<128x128xf32>
      %c128_i32 = arith.constant 128 : i32
      %18 = arith.muli %arg1, %c128_i32 : i32
      %19 = tpu.iota {dimensions = array<i32: 0>} : vector<128x128xi32>
      %20 = vector.broadcast %18 : i32 to vector<128x128xi32>
      %21 = arith.addi %20, %19 : vector<128x128xi32>
      %c128_i32_12 = arith.constant 128 : i32
      %22 = arith.muli %arg2, %c128_i32_12 : i32
      %23 = tpu.iota {dimensions = array<i32: 1>} : vector<128x128xi32>
      %24 = vector.broadcast %22 : i32 to vector<128x128xi32>
      %25 = arith.addi %24, %23 : vector<128x128xi32>
      %26 = arith.cmpi sge, %21, %25 : vector<128x128xi32>
      %cst_13 = arith.constant -1.000000e+30 : f32
      %27 = vector.broadcast %cst_13 : f32 to vector<128x128xf32>
      %28 = arith.select %26, %17, %27 : vector<128x128xi1>, vector<128x128xf32>
      %c0_14 = arith.constant 0 : index
      %c0_15 = arith.constant 0 : index
      %29 = vector.load %arg7[%c0_14, %c0_15] : memref<128x1xf32, #tpu.memory_space<vmem>>, vector<128x1xf32>
      %cst_16 = arith.constant dense<0xFF800000> : vector<128xf32>
      %30 = vector.multi_reduction <maximumf>, %28, %cst_16 [1] : vector<128x128xf32> to vector<128xf32>
      %31 = vector.shape_cast %30 : vector<128xf32> to vector<128x1xf32>
      %32 = arith.maximumf %29, %31 : vector<128x1xf32>
      %33 = arith.subf %29, %32 : vector<128x1xf32>
      %34 = math.exp %33 : vector<128x1xf32>
      %35 = vector.broadcast %32 : vector<128x1xf32> to vector<128x128xf32>
      %36 = arith.subf %28, %35 : vector<128x128xf32>
      %37 = math.exp %36 : vector<128x128xf32>
      %c0_17 = arith.constant 0 : index
      %c0_18 = arith.constant 0 : index
      %38 = vector.load %arg8[%c0_17, %c0_18] : memref<128x1xf32, #tpu.memory_space<vmem>>, vector<128x1xf32>
      %39 = arith.mulf %34, %38 : vector<128x1xf32>
      %cst_19 = arith.constant dense<0.000000e+00> : vector<128xf32>
      %40 = vector.multi_reduction <add>, %37, %cst_19 [1] : vector<128x128xf32> to vector<128xf32>
      %41 = vector.shape_cast %40 : vector<128xf32> to vector<128x1xf32>
      %42 = arith.addf %39, %41 : vector<128x1xf32>
      %c0_20 = arith.constant 0 : index
      %c0_21 = arith.constant 0 : index
      %43 = vector.load %arg8[%c0_20, %c0_21] : memref<128x1xf32, #tpu.memory_space<vmem>>, vector<128x1xf32>
      tpu.vector_store %arg8[%c0_20, %c0_21], %42 {strides = array<i32>} : memref<128x1xf32, #tpu.memory_space<vmem>>, vector<128x1xf32>,
      %c0_22 = arith.constant 0 : index
      %c0_23 = arith.constant 0 : index
      %44 = vector.load %arg9[%c0_22, %c0_23] : memref<128x32xf32, #tpu.memory_space<vmem>>, vector<128x32xf32>
      %45 = vector.broadcast %34 : vector<128x1xf32> to vector<128x32xf32>
      %46 = arith.mulf %45, %44 : vector<128x32xf32>
      %47 = arith.truncf %37 : vector<128x128xf32> to vector<128x128xbf16>
      %cst_24 = arith.constant dense<0.000000e+00> : vector<128x32xf32>
      %48 = tpu.matmul %47, %14, %cst_24 {dimension_numbers = #tpu.dot_dimension_numbers<[1], [0], [0], [1], [0, 0, 1, 1], [], []>} : vector<128x128xbf16>, vector<128x32xbf16>, vector<128x32xf32> -> vector<128x32xf32>
      %49 = arith.addf %46, %48 : vector<128x32xf32>
      %c0_25 = arith.constant 0 : index
      %c0_26 = arith.constant 0 : index
      %50 = vector.load %arg9[%c0_25, %c0_26] : memref<128x32xf32, #tpu.memory_space<vmem>>, vector<128x32xf32>
      tpu.vector_store %arg9[%c0_25, %c0_26], %49 {strides = array<i32>} : memref<128x32xf32, #tpu.memory_space<vmem>>, vector<128x32xf32>,
      %c0_27 = arith.constant 0 : index
      %c0_28 = arith.constant 0 : index
      %51 = vector.load %arg7[%c0_27, %c0_28] : memref<128x1xf32, #tpu.memory_space<vmem>>, vector<128x1xf32>
      tpu.vector_store %arg7[%c0_27, %c0_28], %32 {strides = array<i32>} : memref<128x1xf32, #tpu.memory_space<vmem>>, vector<128x1xf32>,
    } else {
    }
    %c1_i32 = arith.constant 1 : i32
    %6 = arith.cmpi eq, %arg2, %c1_i32 : i32
    %7 = arith.extui %6 : i1 to i32
    %c0_i32_2 = arith.constant 0 : i32
    %8 = arith.cmpi ne, %7, %c0_i32_2 : i32
    scf.if %8 {
      %c0 = arith.constant 0 : index
      %c0_3 = arith.constant 0 : index
      %9 = vector.load %arg8[%c0, %c0_3] : memref<128x1xf32, #tpu.memory_space<vmem>>, vector<128x1xf32>
      %10 = tpu.reciprocal %9 {approx = true} : vector<128x1xf32> -> vector<128x1xf32>
      %c0_4 = arith.constant 0 : index
      %c0_5 = arith.constant 0 : index
      %11 = vector.load %arg9[%c0_4, %c0_5] : memref<128x32xf32, #tpu.memory_space<vmem>>, vector<128x32xf32>
      %12 = vector.broadcast %10 : vector<128x1xf32> to vector<128x32xf32>
      %13 = arith.mulf %11, %12 : vector<128x32xf32>
      %14 = arith.truncf %13 : vector<128x32xf32> to vector<128x32xbf16>
      %c0_6 = arith.constant 0 : index
      %c0_7 = arith.constant 0 : index
      %c0_8 = arith.constant 0 : index
      %15 = vector.load %arg6[%c0_6, %c0_7, %c0_8] : memref<1x128x32xbf16, #tpu.memory_space<vmem>>, vector<1x128x32xbf16>
      %16 = vector.shape_cast %15 : vector<1x128x32xbf16> to vector<128x32xbf16>
      %17 = vector.shape_cast %14 : vector<128x32xbf16> to vector<1x128x32xbf16>
      tpu.vector_store %arg6[%c0_6, %c0_7, %c0_8], %17 {strides = array<i32>} : memref<1x128x32xbf16, #tpu.memory_space<vmem>>, vector<1x128x32xbf16>,
    } else {
    }
    return
  }
  func.func @transform_0(%arg0: i32, %arg1: i32, %arg2: i32) -> (i32, i32, i32) {
    %c0_i32 = arith.constant 0 : i32
    %c0_i32_0 = arith.constant 0 : i32
    return %arg0, %arg1, %c0_i32 : i32, i32, i32
  }
  func.func @transform_1(%arg0: i32, %arg1: i32, %arg2: i32) -> (i32, i32, i32) {
    %c0_i32 = arith.constant 0 : i32
    %c0_i32_0 = arith.constant 0 : i32
    return %arg0, %arg2, %c0_i32 : i32, i32, i32
  }
  func.func @transform_2(%arg0: i32, %arg1: i32, %arg2: i32) -> (i32, i32, i32) {
    %c0_i32 = arith.constant 0 : i32
    %c0_i32_0 = arith.constant 0 : i32
    return %arg0, %arg2, %c0_i32 : i32, i32, i32
  }
  func.func @transform_3(%arg0: i32, %arg1: i32, %arg2: i32) -> (i32, i32, i32) {
    %c0_i32 = arith.constant 0 : i32
    %c0_i32_0 = arith.constant 0 : i32
    return %arg0, %arg1, %c0_i32 : i32, i32, i32
  }
}

module attributes {stable_mosaic.version = 11 : i64} {
  func.func @_linear_kernel(%arg0: i32, %arg1: memref<128x128xbf16, #tpu.memory_space<vmem>>, %arg2: memref<128x128xbf16, #tpu.memory_space<vmem>>, %arg3: memref<1x128xf32, #tpu.memory_space<vmem>>, %arg4: memref<128x128xf32, #tpu.memory_space<vmem>>) attributes {dimension_semantics = [#tpu.dimension_semantics<parallel>], iteration_bounds = array<i64: 4>, scalar_prefetch = 0 : i64, scratch_operands = 0 : i64, tpu.core_type = #tpu.core_type<tc>, window_params = [{transform_indices = @transform_0, window_bounds = array<i64: 128, 128>}, {pipeline_mode = #tpu.pipeline_mode<synchronous>, transform_indices = @transform_1, window_bounds = array<i64: 128, 128>}, {pipeline_mode = #tpu.pipeline_mode<synchronous>, transform_indices = @transform_2, window_bounds = array<i64: 1, 128>}, {transform_indices = @transform_3, window_bounds = array<i64: 128, 128>}]} {
    %c0 = arith.constant 0 : index
    %c0_0 = arith.constant 0 : index
    %0 = vector.load %arg1[%c0, %c0_0] : memref<128x128xbf16, #tpu.memory_space<vmem>>, vector<128x128xbf16>
    %c0_1 = arith.constant 0 : index
    %c0_2 = arith.constant 0 : index
    %1 = vector.load %arg2[%c0_1, %c0_2] : memref<128x128xbf16, #tpu.memory_space<vmem>>, vector<128x128xbf16>
    %cst = arith.constant dense<0.000000e+00> : vector<128x128xf32>
    %2 = tpu.matmul %0, %1, %cst {dimension_numbers = #tpu.dot_dimension_numbers<[1], [0], [0], [1], [0, 0, 1, 1], [], []>} : vector<128x128xbf16>, vector<128x128xbf16>, vector<128x128xf32> -> vector<128x128xf32>
    %c0_3 = arith.constant 0 : index
    %c0_4 = arith.constant 0 : index
    %3 = vector.load %arg3[%c0_3, %c0_4] : memref<1x128xf32, #tpu.memory_space<vmem>>, vector<1x128xf32>
    %4 = vector.broadcast %3 : vector<1x128xf32> to vector<128x128xf32>
    %5 = arith.addf %2, %4 : vector<128x128xf32>
    %c0_5 = arith.constant 0 : index
    %c0_6 = arith.constant 0 : index
    %6 = vector.load %arg4[%c0_5, %c0_6] : memref<128x128xf32, #tpu.memory_space<vmem>>, vector<128x128xf32>
    tpu.vector_store %arg4[%c0_5, %c0_6], %5 {strides = array<i32>} : memref<128x128xf32, #tpu.memory_space<vmem>>, vector<128x128xf32>,
    return
  }
  func.func @transform_0(%arg0: i32) -> (i32, i32) {
    %c0_i32 = arith.constant 0 : i32
    %c0_i32_0 = arith.constant 0 : i32
    return %arg0, %c0_i32 : i32, i32
  }
  func.func @transform_1(%arg0: i32) -> (i32, i32) {
    %c0_i32 = arith.constant 0 : i32
    %c0_i32_0 = arith.constant 0 : i32
    %c0_i32_1 = arith.constant 0 : i32
    return %c0_i32, %c0_i32_0 : i32, i32
  }
  func.func @transform_2(%arg0: i32) -> (i32, i32) {
    %c0_i32 = arith.constant 0 : i32
    %c0_i32_0 = arith.constant 0 : i32
    %c0_i32_1 = arith.constant 0 : i32
    return %c0_i32, %c0_i32_0 : i32, i32
  }
  func.func @transform_3(%arg0: i32) -> (i32, i32) {
    %c0_i32 = arith.constant 0 : i32
    %c0_i32_0 = arith.constant 0 : i32
    return %arg0, %c0_i32 : i32, i32
  }
}

</mosaic_0001>

<bundles_post_ra>
// kernel: causal_self_attention_forward.3
= control target key start
LH: loop header
LB: loop body
LE: loop exit
PB: predicated region body
PF: predicated region fallthrough
CT: control target
= control target key end

     0   :  { %8 = vsyncpa [#allocation3], 0  ;;  %s1520_s0 = inlined_call_operand.hbm [shape: f32[512,128], index: 0, kind: input, shape index: {}]   ;;  %s1521_s1 = inlined_call_operand.hbm [shape: bf16[128,384], index: 1, kind: input, shape index: {}]   ;;  %s1522_s2 = inlined_call_operand.vmem [shape: f32[1,384], index: 2, kind: input, shape index: {}]   ;;  %s1523_s3 = inlined_call_operand.vmem [shape: bf16[512,384], index: 3, kind: output, shape index: {}]  }
   0x1   :  { %10 = vsyncpa [#allocation3 + $0x1], 0 }
   0x2   :  { %11 = vsyncpa [#allocation5], 0  ;;  %s1258_s12 = smov 0   ;;  %s1260_s13 = smov 0  }
   0x3   :  { %s1262_s14 = smov 0   ;;  %s1264_s15 = smov 0  }
   0x4 LB: > { %s893_s16 = sadd.s32 4294967295, %s1229_s15   ;;  %p37_p0 = scmp.ne.s32.totalorder %s1221_s13, %s1217_s12  ;;  %s1229_s15 = sphi %s1264_s15, %s1539_s15   ;;  %s1225_s14 = sphi %s1262_s14, %s1538_s14   ;;  %s1221_s13 = sphi %s1260_s13, %s1537_s13   ;;  %s1217_s12 = sphi %s1258_s12, %s1536_s12  }
   0x5   : > { %p1280_p1 = scmp.eq.s32.totalorder %s893_s16, 0  ;;  %p895_p2 = scmp.ge.s32.totalorder %s1229_s15, 1 }
   0x6   : > { %p116_p3 = scmp.lt.s32.totalorder %s1229_s15, 5  ;;  %s1231_s20 = smov [#allocation4]  }
   0x7   : > { %s1528_s17 = scalar_select %p1280_p1, 1, 0 }
   0x8   : > { %p1288_p4 = por %p1280_p1, %p37_p0  ;;  %p1292_p5 = pnand %p895_p2, %p116_p3 }
   0x9   : > { %s128_s21 = sshll.u32 %s1231_s20, 4  ;;  %s1305_s23 = sadd.s32 1, %s1229_s15   ;;  %s129_s21 = int_to_ptr.vmem [resolvable:$true] %s128_s21 }
   0xa   : > { %s1529_s18 = scalar_select %p1288_p4, 1, 0 }
   0xb   : > { %s1530_s19 = scalar_select %p1292_p5, 1, 0 }
   0xc   : > { %p1052_p6 = pneg %p1292_p5  ;;  %s24_s24 = sadd.s32 1, %s1225_s14 }
   0xd   : > { %s21_s25 = ssub.s32 %s1229_s15, %s1305_s23  ;;  %s1133_s28 = scalar_lea.hbm %s1521_s1, 3072 }
   0xe   : > { %p1300_p7 = pnand %p1052_p6, %p1280_p1  ;;  %p1134_p8 = scmp.ne.s32.totalorder %s1521_s1, %s1133_s28 }
   0xf   : > { %p1140_p12 = scmp.lt.u32.totalorder %s1133_s28, %s1521_s1 }
  0x10   : > { %p1135_p9 = pneg %p1300_p7 }
  0x12   : > { %p1136_p10 = pnand %p1135_p9, %p1134_p8 }
  0x14   : > { %p1137_p11 = pneg %p1136_p10 }
  0x16   : > { %p1142_p13 = pnand %p1140_p12, %p1137_p11 }
  0x18   : > { %1145 = shalt.err (!%p1142_p13)
}
  0x19   : > { %s1146_s6 = scalar_lea.vmem %s129_s21, 3072  ;;  %p1154_p6 = scmp.lt.s32.totalorder %s129_s21, %s129_s21 }
  0x1a   : > { %p1147_p0 = scmp.ne.s32.totalorder %s129_s21, %s1146_s6  ;;  %p1155_p1 = scmp.lt.s32.totalorder %s1146_s6, %s1146_s6 }
  0x1c   : > { %p1149_p2 = pnand %p1147_p0, %p1135_p9  ;;  %p1156_p4 = por %p1155_p1, %p1154_p6 }
  0x1e   : > { %p1150_p3 = pneg %p1149_p2 }
  0x20   : > { %p1157_p5 = pnand %p1156_p4, %p1150_p3 }
  0x22   : > { %1160 = shalt.err (!%p1157_p5)
}
  0x23   : > { %s1232_s7 = smov 192   ;;  %s1233_s8 = smov 12  }
  0x24   : > { %1055 = dma.hbm_to_vmem [thread:$0]  (!%p1300_p7), %s1521_s1, 3072, %s129_s21, [#allocation5], %s1232_s7, %s1232_s7, %s1233_s8  }
  0x25   : > { %p22_p8 = scmp.eq.s32.totalorder %s21_s25, 0  ;;  %p31_p9 = scmp.ne.s32.totalorder %s1225_s14, %s1221_s13 }
  0x26   : > { %p32_p1 = scmp.eq.s32.totalorder %s1229_s15, 0  ;;  %p1061_p4 = scmp.lt.s32.totalorder %s1229_s15, 4 }
  0x27   : > { %s1331_s11 = scalar_select %p22_p8, %s1225_s14, %s24_s24  }
  0x28   : > { %p33_p5 = por %p32_p1, %p31_p9  ;;  %s145_s12 = sand.u32 1, %s1225_s14  }
  0x29   : > { %s898_s20 = sshll.u32 %s145_s12, 7  ;;  %s964_s26 = sshll.u32 %s1229_s15, 11 }
  0x2a   : > { %s1338_s29 = scalar_lea.hbm %s1520_s0, %s964_s26  ;;  %s149_s21 = scalar_lea.vmem [#allocation2], %s898_s20 }
  0x2b   : > { %s156_s22 = sshll.u32 %s149_s21, 4  ;;  %p1342_p7 = pnand %p1061_p4, %p33_p5  ;;  %s1340_s22 = int_to_ptr.vmem [resolvable:$true] %s156_s22 }
  0x2c   : > { %s1346_s25 = scalar_lea.sflag [#allocation3], %s145_s12  ;;  %s1161_s30 = scalar_lea.hbm %s1338_s29, 2048 }
  0x2d   : > { %p1162_p10 = scmp.ne.s32.totalorder %s1338_s29, %s1161_s30  ;;  %p1163_p11 = pneg %p1342_p7 }
  0x2e   : > { %s1166_s6 = scalar_lea.hbm %s1520_s0, 8192  ;;  %p1167_p0 = scmp.lt.u32.totalorder %s1338_s29, %s1520_s0 }
  0x2f   : > { %p1164_p12 = pnand %p1163_p11, %p1162_p10  ;;  %p1168_p2 = scmp.lt.u32.totalorder %s1166_s6, %s1161_s30 }
  0x30   : > { %p1170_p6 = scmp.lt.u32.totalorder %s1161_s30, %s1338_s29 }
  0x31   : > { %p1165_p13 = pneg %p1164_p12  ;;  %p1169_p3 = por %p1168_p2, %p1167_p0 }
  0x33   : > { %p1171_p8 = por %p1170_p6, %p1169_p3 }
  0x35   : > { %p1172_p9 = pnand %p1171_p8, %p1165_p13 }
  0x37   : > { %1175 = shalt.err (!%p1172_p9)
}
  0x38   : > { %s1176_s9 = scalar_lea.vmem %s1340_s22, 2048  ;;  %s1234_s10 = smov [#allocation2]  }
  0x39   : > { %p1177_p1 = scmp.ne.s32.totalorder %s1340_s22, %s1176_s9  ;;  %s1181_s12 = sshll.u32 %s1234_s10, 4  ;;  %s1182_s12 = int_to_ptr.vmem [resolvable:$false] %s1181_s12 }
  0x3a   : > { %s1183_s20 = scalar_lea.vmem %s1182_s12, 4096  ;;  %p1184_p10 = scmp.lt.s32.totalorder %s1340_s22, %s1182_s12 }
  0x3b   : > { %p1179_p4 = pnand %p1177_p1, %p1163_p11  ;;  %p1185_p12 = scmp.lt.s32.totalorder %s1183_s20, %s1176_s9 }
  0x3d   : > { %p1180_p5 = pneg %p1179_p4  ;;  %p1186_p0 = por %p1185_p12, %p1184_p10 }
  0x3f   : > { %p1187_p2 = pnand %p1186_p0, %p1180_p5 }
  0x41   : > { %1190 = shalt.err (!%p1187_p2)
}
  0x42   : > { %s1235_s26 = smov 128   ;;  %s1236_s27 = smov 8  }
  0x43   : > { %1059 = dma.hbm_to_vmem [thread:$0]  (!%p1342_p7), %s1338_s29, 2048, %s1340_s22, %s1346_s25, %s1235_s26, %s1235_s26, %s1236_s27  }
  0x44   : > { %p1533_p11 = scmp.ne.s32.totalorder %s1530_s19, 0 }
  0x45   : > { %s170_s28 = sand.u32 (!%p1533_p11), 1, %s1221_s13   ;;  %p1534_p13 = scmp.ne.s32.totalorder (!%p1533_p11), %s1529_s18, 0 }
  0x46   : > { %168 = sbr.rel (%p1533_p11) target bundleno = 390 (0x186), region = 32  ;;  %s902_s21 = sshll.u32 (!%p1533_p11), %s170_s28, 7 }
  0x47   : > { %s171_s30 = scalar_lea.sflag (!%p1533_p11), [#allocation3], %s170_s28  ;;  %s1377_s4 = scalar_lea.vmem (!%p1533_p11), [#allocation2], %s902_s21 }
  0x4d   : > { %1208 = dma.done.wait (%p1534_p13), %s171_s30, 2048  }
  0x4e   : > { %1210 = vsyncadd (%p1534_p13), %s171_s30, 4294965248  ;;  %p1535_p3 = scmp.ne.s32.totalorder %s1528_s17, 0 }
  0x50   : > { %1212 = dma.done.wait (%p1535_p3), [#allocation5], 3072  }
  0x51   : > { %1214 = vsyncadd (%p1535_p3), [#allocation5], 4294964224  ;;  %v1237_v0 = vmov 0   ;;  %v1101_v1 = vld [vmem:[#allocation4 + $0x4] ss:$12 sps:$4 sm:$0xff]   ;;  %v212_v12 = vld [vmem:[%s1377_s4 + $0x8] sm:$0xff]  ;;  %v269_v49 = vlaneseq }
  0x52   : > { %444 = vmatprep.mubr.bf16.mxu0 %v1237_v0  ;;  %v1103_v2 = vld [vmem:[#allocation4] ss:$12 sps:$4 sm:$0xff]   ;;  %412 = vmatprep.subr.bf16.mxu0 %v1101_v1  ;;  %v1104_v3 = vld [vmem:[#allocation4 + $0x1c] ss:$12 sps:$4 sm:$0xff]   ;;  %v1106_v4 = vld [vmem:[#allocation4 + $0x18] ss:$12 sps:$4 sm:$0xff]  }
  0x53   : > { %413 = vmatpush1.bf16.msra.mxu0 %v1103_v2  ;;  %v1107_v5 = vld [vmem:[#allocation4 + $0x34] ss:$12 sps:$4 sm:$0xff]   ;;  %v1109_v6 = vld [vmem:[#allocation4 + $0x30] ss:$12 sps:$4 sm:$0xff]   ;;  %v1110_v7 = vld [vmem:[#allocation4 + $0x4c] ss:$12 sps:$4 sm:$0xff]  }
  0x54   : > { %414 = vmatprep.subr.bf16.mxu0 %v1104_v3  ;;  %v1112_v8 = vld [vmem:[#allocation4 + $0x48] ss:$12 sps:$4 sm:$0xff]   ;;  %v1113_v9 = vld [vmem:[#allocation4 + $0x64] ss:$12 sps:$4 sm:$0xff]   ;;  %v1126_v13 = vld [vmem:[#allocation4 + $0x20] ss:$12 sps:$4 sm:$0xff]  }
  0x55   : > { %v1125_v10 = vld [vmem:[#allocation4 + $0x8] ss:$12 sps:$4 sm:$0xff]   ;;  %v211_v11 = vld [vmem:[%s1377_s4] sm:$0xff]  ;;  %v1128_v19 = vld [vmem:[#allocation4 + $0x50] ss:$12 sps:$4 sm:$0xff]   ;;  %s904_s17 = sshll.u32 %s893_s16, 4 }
  0x56   : > { %1013 = vmatprep.subr.bf16.mxu1 %v1125_v10  ;;  %v1115_v14 = vld [vmem:[#allocation4 + $0x60] ss:$12 sps:$4 sm:$0xff]   ;;  %v227_v15 = vpack.c.bf16 %v212_v12, %v211_v11  ;;  %v1127_v16 = vld [vmem:[#allocation4 + $0x38] ss:$12 sps:$4 sm:$0xff]   ;;  %v1116_v17 = vld [vmem:[#allocation4 + $0x7c] ss:$12 sps:$4 sm:$0xff]  }
  0x57   : > { %415 = vmatpush1.bf16.msra.mxu0 %v1106_v4  ;;  %1014 = vmatpush3.bf16.msra.mxu1 %v1125_v10  ;;  %v1118_v18 = vld [vmem:[#allocation4 + $0x78] ss:$12 sps:$4 sm:$0xff]   ;;  %v1119_v20 = vld [vmem:[#allocation4 + $0x94] ss:$12 sps:$4 sm:$0xff]   ;;  %v1121_v21 = vld [vmem:[#allocation4 + $0x90] ss:$12 sps:$4 sm:$0xff]  }
  0x58   : > { %416 = vmatprep.subr.bf16.mxu0 %v1107_v5  ;;  %1015 = vmatprep.subr.bf16.mxu1 %v1126_v13  ;;  %v1129_v22 = vld [vmem:[#allocation4 + $0x68] ss:$12 sps:$4 sm:$0xff]   ;;  %v1122_v23 = vld [vmem:[#allocation4 + $0xac] ss:$12 sps:$4 sm:$0xff]   ;;  %v1132_v29 = vld [vmem:[#allocation4 + $0xb0] ss:$12 sps:$4 sm:$0xff]  }
  0x59   : > { %1029 = vmatprep.mubr.bf16.mxu1 %v227_v15  ;;  %v1124_v24 = vld [vmem:[#allocation4 + $0xa8] ss:$12 sps:$4 sm:$0xff]   ;;  %v1130_v25 = vld [vmem:[#allocation4 + $0x80] ss:$12 sps:$4 sm:$0xff]   ;;  %v1131_v26 = vld [vmem:[#allocation4 + $0x98] ss:$12 sps:$4 sm:$0xff]  }
  0x5a   : > { %v213_v27 = vld [vmem:[%s1377_s4 + $0x10] sm:$0xff]  ;;  %v214_v28 = vld [vmem:[%s1377_s4 + $0x18] sm:$0xff]  ;;  %v215_v31 = vld [vmem:[%s1377_s4 + $0x20] sm:$0xff]  ;;  %v270_v50 = vshrl.u32 %v269_v49, 7  ;;  %p204_p7 = scmp.lt.s32.totalorder %s904_s17, 63 }
  0x5b   : > { %417 = vmatpush1.bf16.msra.mxu0 %v1109_v6  ;;  %1016 = vmatpush3.bf16.msra.mxu1 %v1126_v13  ;;  %v228_v30 = vpack.c.bf16 %v214_v28, %v213_v27  ;;  %v216_v32 = vld [vmem:[%s1377_s4 + $0x28] sm:$0xff]  ;;  %v217_v34 = vld [vmem:[%s1377_s4 + $0x30] sm:$0xff]  ;;  %v218_v35 = vld [vmem:[%s1377_s4 + $0x38] sm:$0xff] }
  0x5c   : > { %418 = vmatprep.subr.bf16.mxu0 %v1110_v7  ;;  %1017 = vmatprep.subr.bf16.mxu1 %v1127_v16  ;;  %v229_v33 = vpack.c.bf16 %v216_v32, %v215_v31  ;;  %v219_v36 = vld [vmem:[%s1377_s4 + $0x40] sm:$0xff]  ;;  %v220_v37 = vld [vmem:[%s1377_s4 + $0x48] sm:$0xff]  ;;  %v230_v38 = vpack.c.bf16 %v218_v35, %v217_v34  ;;  %v221_v40 = vld [vmem:[%s1377_s4 + $0x50] sm:$0xff]  ;;  %v271_v51 = vsub.s32 0, %v270_v50  ;;  %v275_v53 = vsub.s32 1, %v270_v50  ;;  %s1541_s17 = smov (!%p204_p7, %s904_s17), 63 }
  0x5d   : > { %v231_v39 = vpack.c.bf16 %v220_v37, %v219_v36  ;;  %v222_v41 = vld [vmem:[%s1377_s4 + $0x58] sm:$0xff]  ;;  %v223_v42 = vld [vmem:[%s1377_s4 + $0x60] sm:$0xff]  ;;  %v224_v43 = vld [vmem:[%s1377_s4 + $0x68] sm:$0xff]  ;;  %s1045_s29 = smul.u32 12, %s1541_s17  ;;  %v279_v1 = vsub.s32 2, %v270_v50 }
  0x5e   : > { %v232_v44 = vpack.c.bf16 %v222_v41, %v221_v40  ;;  %v233_v45 = vpack.c.bf16 %v224_v43, %v223_v42  ;;  %v225_v46 = vld [vmem:[%s1377_s4 + $0x70] sm:$0xff]  ;;  %v226_v47 = vld [vmem:[%s1377_s4 + $0x78] sm:$0xff]  ;;  %v267_v52 = vld [vmem:[%s1522_s2] sm:$0x7] }
  0x5f   : > { %419 = vmatpush1.bf16.msra.mxu0 %v1112_v8  ;;  %1018 = vmatpush3.bf16.msra.mxu1 %v1127_v16  ;;  %v234_v48 = vpack.c.bf16 %v226_v47, %v225_v46  ;;  %v1416_v54 = vrot.slane %v267_v52, %v271_v51  ;;  %v1418_v55 = vrot.slane %v267_v52, %v275_v53  ;;  %s1425_s22 = scalar_lea.vmem %s1523_s3, %s1045_s29 }
  0x60   : > { %420 = vmatprep.subr.bf16.mxu0 %v1113_v9  ;;  %1019 = vmatprep.subr.bf16.mxu1 %v1128_v19  ;;  %v1431_v4 = vrot.slane %v267_v52, %v279_v1 }
  0x63   : > { %421 = vmatpush1.bf16.msra.mxu0 %v1115_v14  ;;  %1020 = vmatpush3.bf16.msra.mxu1 %v1128_v19 }
  0x64   : > { %422 = vmatprep.subr.bf16.mxu0 %v1116_v17  ;;  %1021 = vmatprep.subr.bf16.mxu1 %v1129_v22 }
  0x67   : > { %423 = vmatpush1.bf16.msra.mxu0 %v1118_v18  ;;  %1022 = vmatpush3.bf16.msra.mxu1 %v1129_v22 }
  0x68   : > { %424 = vmatprep.subr.bf16.mxu0 %v1119_v20  ;;  %1023 = vmatprep.subr.bf16.mxu1 %v1130_v25 }
  0x6b   : > { %425 = vmatpush1.bf16.msra.mxu0 %v1121_v21  ;;  %1024 = vmatpush3.bf16.msra.mxu1 %v1130_v25 }
  0x6c   : > { %426 = vmatprep.subr.bf16.mxu0 %v1122_v23  ;;  %1025 = vmatprep.subr.bf16.mxu1 %v1131_v26 }
  0x6f   : > { %427 = vmatpush1.bf16.msra.mxu0 %v1124_v24  ;;  %1026 = vmatpush3.bf16.msra.mxu1 %v1131_v26 }
  0x70   : > { %1027 = vmatprep.subr.bf16.mxu1 %v1132_v29 }
  0x72   : > { %445 = vmatmul.mubr.bf16.vlgmr.msra.gmra.mrb[0].mxu0 %v227_v15 }
  0x73   : > { %454 = vmatprep.mubr.bf16.mxu0 %v1237_v0  ;;  %1028 = vmatpush3.bf16.msra.mxu1 %v1132_v29 }
  0x76   : > { %1030 = vmatmul.mubr.bf16.vlgmr.msra.gmra.mrb[0].mxu1 %v228_v30 }
  0x77   : > { %1033 = vmatprep.mubr.bf16.mxu1 %v229_v33 }
  0x7a   : > { %455 = vmatmul.mubr.bf16.gmra.mrb[4].mxu0 %v228_v30 }
  0x7b   : > { %464 = vmatprep.mubr.bf16.mxu0 %v1237_v0 }
  0x7e   : > { %1034 = vmatmul.mubr.bf16.gmra.mrb[4].mxu1 %v230_v38 }
  0x7f   : > { %1037 = vmatprep.mubr.bf16.mxu1 %v231_v39 }
  0x82   : > { %465 = vmatmul.mubr.bf16.gmra.mrb[8].mxu0 %v229_v33 }
  0x83   : > { %474 = vmatprep.mubr.bf16.mxu0 %v1237_v0 }
  0x86   : > { %1038 = vmatmul.mubr.bf16.gmra.mrb[8].mxu1 %v232_v44 }
  0x87   : > { %1041 = vmatprep.mubr.bf16.mxu1 %v233_v45 }
  0x8a   : > { %475 = vmatmul.mubr.bf16.gmra.mrb[12].mxu0 %v230_v38 }
  0x8b   : > { %484 = vmatprep.mubr.bf16.mxu0 %v1237_v0 }
  0x8e   : > { %1042 = vmatmul.mubr.bf16.gmra.mrb[12].mxu1 %v234_v48 }
  0x92   : > { %485 = vmatmul.mubr.bf16.gmra.mrb[16].mxu0 %v231_v39 }
  0x93   : > { %494 = vmatprep.mubr.bf16.mxu0 %v1237_v0 }
  0x9a   : > { %495 = vmatmul.mubr.bf16.gmra.mrb[20].mxu0 %v232_v44 }
  0x9b   : > { %504 = vmatprep.mubr.bf16.mxu0 %v1237_v0 }
  0xa2   : > { %505 = vmatmul.mubr.bf16.gmra.mrb[24].mxu0 %v233_v45 }
  0xa3   : > { %514 = vmatprep.mubr.bf16.mxu0 %v1237_v0 }
  0xaa   : > { %515 = vmatmul.mubr.bf16.gmra.mrb[28].mxu0 %v234_v48 }
 0x145   : > { %v446_v56 = vpop.f32.mrb[0].mxu0 }
 0x146   : > { %v447_v57 = vadd.f32 %v446_v56, %v1416_v54  ;;  %v448_v58 = vpop.f32.mrb[1].mxu0 }
 0x147   : > { %v449_v59 = vadd.f32 %v448_v58, %v1418_v55  ;;  %v450_v60 = vpop.f32.mrb[2].mxu0 }
 0x148   : > { %v451_v61 = vadd.f32 %v450_v60, %v1416_v54  ;;  %v452_v62 = vpop.f32.mrb[3].mxu0 }
 0x149   : > { %v965_v63 = vpack.c.bf16 %v449_v59, %v447_v57  ;;  %v453_v0 = vadd.f32 %v452_v62, %v1418_v55  ;;  %v1031_v11 = vpop.f32.mrb[0].mxu1 }
 0x14a   : > { %v568_v14 = vadd.f32 %v1031_v11, %v1431_v4  ;;  %v559_v15 = vpop.f32.mrb[1].mxu1 }
 0x14b   : > { %782 = vst [vmem:[%s1425_s22] sm:$0xff] %v965_v63  ;;  %v967_v2 = vpack.c.bf16 %v453_v0, %v451_v61  ;;  %v560_v16 = vadd.f32 %v559_v15, %v1431_v4  ;;  %v1032_v17 = vpop.f32.mrb[2].mxu1 }
 0x14c   : > { %v970_v19 = vpack.c.bf16 %v568_v14, %v568_v14  ;;  %v571_v20 = vadd.f32 %v1032_v17, %v1431_v4  ;;  %v562_v21 = vpop.f32.mrb[3].mxu1 }
 0x14d   : > { %784 = vst [vmem:[%s1425_s22 + $0xc] sm:$0xff] %v967_v2  ;;  %v456_v3 = vpop.f32.mrb[4].mxu0  ;;  %v966_v22 = vpack.c.bf16 %v560_v16, %v560_v16  ;;  %v563_v23 = vadd.f32 %v562_v21, %v1431_v4 }
 0x14e   : > { %v457_v5 = vadd.f32 %v456_v3, %v1416_v54  ;;  %v458_v6 = vpop.f32.mrb[5].mxu0  ;;  %787 = vst [vmem:[%s1425_s22 + $0x20] sm:$0xf] %v970_v19  ;;  %v972_v25 = vpack.c.bf16 %v571_v20, %v571_v20 }
 0x14f   : > { %v459_v7 = vadd.f32 %v458_v6, %v1418_v55  ;;  %v460_v8 = vpop.f32.mrb[6].mxu0  ;;  %783 = vst [vmem:[%s1425_s22 + $0x8] sm:$0xf] %v966_v22  ;;  %v968_v28 = vpack.c.bf16 %v563_v23, %v563_v23 }
 0x150   : > { %v461_v9 = vadd.f32 %v460_v8, %v1416_v54  ;;  %v462_v10 = vpop.f32.mrb[7].mxu0  ;;  %789 = vst [vmem:[%s1425_s22 + $0x2c] sm:$0xf] %v972_v25 }
 0x151   : > { %v969_v12 = vpack.c.bf16 %v459_v7, %v457_v5  ;;  %v463_v13 = vadd.f32 %v462_v10, %v1418_v55  ;;  %785 = vst [vmem:[%s1425_s22 + $0x14] sm:$0xf] %v968_v28  ;;  %v1035_v33 = vpop.f32.mrb[4].mxu1 }
 0x152   : > { %v584_v36 = vadd.f32 %v1035_v33, %v1431_v4  ;;  %v575_v37 = vpop.f32.mrb[5].mxu1 }
 0x153   : > { %786 = vst [vmem:[%s1425_s22 + $0x18] sm:$0xff] %v969_v12  ;;  %v971_v18 = vpack.c.bf16 %v463_v13, %v461_v9  ;;  %v576_v38 = vadd.f32 %v575_v37, %v1431_v4  ;;  %v1036_v39 = vpop.f32.mrb[6].mxu1 }
 0x154   : > { %v978_v41 = vpack.c.bf16 %v584_v36, %v584_v36  ;;  %v587_v42 = vadd.f32 %v1036_v39, %v1431_v4  ;;  %v578_v43 = vpop.f32.mrb[7].mxu1 }
 0x155   : > { %788 = vst [vmem:[%s1425_s22 + $0x24] sm:$0xff] %v971_v18  ;;  %v466_v24 = vpop.f32.mrb[8].mxu0  ;;  %v974_v44 = vpack.c.bf16 %v576_v38, %v576_v38  ;;  %v579_v45 = vadd.f32 %v578_v43, %v1431_v4 }
 0x156   : > { %v467_v26 = vadd.f32 %v466_v24, %v1416_v54  ;;  %v468_v27 = vpop.f32.mrb[9].mxu0  ;;  %795 = vst [vmem:[%s1425_s22 + $0x50] sm:$0xf] %v978_v41  ;;  %v980_v47 = vpack.c.bf16 %v587_v42, %v587_v42 }
 0x157   : > { %v469_v29 = vadd.f32 %v468_v27, %v1418_v55  ;;  %v470_v30 = vpop.f32.mrb[10].mxu0  ;;  %791 = vst [vmem:[%s1425_s22 + $0x38] sm:$0xf] %v974_v44  ;;  %v976_v50 = vpack.c.bf16 %v579_v45, %v579_v45 }
 0x158   : > { %v471_v31 = vadd.f32 %v470_v30, %v1416_v54  ;;  %v472_v32 = vpop.f32.mrb[11].mxu0  ;;  %797 = vst [vmem:[%s1425_s22 + $0x5c] sm:$0xf] %v980_v47 }
 0x159   : > { %v973_v34 = vpack.c.bf16 %v469_v29, %v467_v26  ;;  %v473_v35 = vadd.f32 %v472_v32, %v1418_v55  ;;  %793 = vst [vmem:[%s1425_s22 + $0x44] sm:$0xf] %v976_v50  ;;  %v1039_v57 = vpop.f32.mrb[8].mxu1 }
 0x15a   : > { %v600_v60 = vadd.f32 %v1039_v57, %v1431_v4  ;;  %v591_v61 = vpop.f32.mrb[9].mxu1 }
 0x15b   : > { %790 = vst [vmem:[%s1425_s22 + $0x30] sm:$0xff] %v973_v34  ;;  %v975_v40 = vpack.c.bf16 %v473_v35, %v471_v31  ;;  %v592_v62 = vadd.f32 %v591_v61, %v1431_v4  ;;  %v1040_v63 = vpop.f32.mrb[10].mxu1 }
 0x15c   : > { %v986_v1 = vpack.c.bf16 %v600_v60, %v600_v60  ;;  %v603_v2 = vadd.f32 %v1040_v63, %v1431_v4  ;;  %v594_v3 = vpop.f32.mrb[11].mxu1 }
 0x15d   : > { %792 = vst [vmem:[%s1425_s22 + $0x3c] sm:$0xff] %v975_v40  ;;  %v476_v46 = vpop.f32.mrb[12].mxu0  ;;  %v982_v5 = vpack.c.bf16 %v592_v62, %v592_v62  ;;  %v595_v6 = vadd.f32 %v594_v3, %v1431_v4 }
 0x15e   : > { %v477_v48 = vadd.f32 %v476_v46, %v1416_v54  ;;  %v478_v49 = vpop.f32.mrb[13].mxu0  ;;  %803 = vst [vmem:[%s1425_s22 + $0x80] sm:$0xf] %v986_v1  ;;  %v988_v8 = vpack.c.bf16 %v603_v2, %v603_v2 }
 0x15f   : > { %v479_v51 = vadd.f32 %v478_v49, %v1418_v55  ;;  %v480_v52 = vpop.f32.mrb[14].mxu0  ;;  %799 = vst [vmem:[%s1425_s22 + $0x68] sm:$0xf] %v982_v5  ;;  %v984_v11 = vpack.c.bf16 %v595_v6, %v595_v6 }
 0x160   : > { %v481_v53 = vadd.f32 %v480_v52, %v1416_v54  ;;  %v482_v56 = vpop.f32.mrb[15].mxu0  ;;  %805 = vst [vmem:[%s1425_s22 + $0x8c] sm:$0xf] %v988_v8 }
 0x161   : > { %v977_v58 = vpack.c.bf16 %v479_v51, %v477_v48  ;;  %v483_v59 = vadd.f32 %v482_v56, %v1418_v55  ;;  %801 = vst [vmem:[%s1425_s22 + $0x74] sm:$0xf] %v984_v11  ;;  %v1043_v16 = vpop.f32.mrb[12].mxu1 }
 0x162   : > { %v616_v19 = vadd.f32 %v1043_v16, %v1431_v4  ;;  %v607_v20 = vpop.f32.mrb[13].mxu1 }
 0x163   : > { %794 = vst [vmem:[%s1425_s22 + $0x48] sm:$0xff] %v977_v58  ;;  %v979_v0 = vpack.c.bf16 %v483_v59, %v481_v53  ;;  %v608_v21 = vadd.f32 %v607_v20, %v1431_v4  ;;  %v1044_v22 = vpop.f32.mrb[14].mxu1 }
 0x164   : > { %v994_v24 = vpack.c.bf16 %v616_v19, %v616_v19  ;;  %v619_v25 = vadd.f32 %v1044_v22, %v1431_v4  ;;  %v610_v26 = vpop.f32.mrb[15].mxu1 }
 0x165   : > { %796 = vst [vmem:[%s1425_s22 + $0x54] sm:$0xff] %v979_v0  ;;  %v486_v7 = vpop.f32.mrb[16].mxu0  ;;  %v990_v27 = vpack.c.bf16 %v608_v21, %v608_v21  ;;  %v611_v28 = vadd.f32 %v610_v26, %v1431_v4 }
 0x166   : > { %v487_v9 = vadd.f32 %v486_v7, %v1416_v54  ;;  %v488_v10 = vpop.f32.mrb[17].mxu0  ;;  %811 = vst [vmem:[%s1425_s22 + $0xb0] sm:$0xf] %v994_v24  ;;  %v996_v30 = vpack.c.bf16 %v619_v25, %v619_v25 }
 0x167   : > { %v489_v12 = vadd.f32 %v488_v10, %v1418_v55  ;;  %v490_v13 = vpop.f32.mrb[18].mxu0  ;;  %807 = vst [vmem:[%s1425_s22 + $0x98] sm:$0xf] %v990_v27  ;;  %v992_v33 = vpack.c.bf16 %v611_v28, %v611_v28 }
 0x168   : > { %v491_v14 = vadd.f32 %v490_v13, %v1416_v54  ;;  %v492_v15 = vpop.f32.mrb[19].mxu0  ;;  %813 = vst [vmem:[%s1425_s22 + $0xbc] sm:$0xf] %v996_v30 }
 0x169   : > { %v981_v17 = vpack.c.bf16 %v489_v12, %v487_v9  ;;  %v493_v18 = vadd.f32 %v492_v15, %v1418_v55  ;;  %809 = vst [vmem:[%s1425_s22 + $0xa4] sm:$0xf] %v992_v33 }
 0x16b   : > { %798 = vst [vmem:[%s1425_s22 + $0x60] sm:$0xff] %v981_v17  ;;  %v983_v23 = vpack.c.bf16 %v493_v18, %v491_v14 }
 0x16d   : > { %800 = vst [vmem:[%s1425_s22 + $0x6c] sm:$0xff] %v983_v23  ;;  %v496_v29 = vpop.f32.mrb[20].mxu0 }
 0x16e   : > { %v497_v31 = vadd.f32 %v496_v29, %v1416_v54  ;;  %v498_v32 = vpop.f32.mrb[21].mxu0 }
 0x16f   : > { %v499_v34 = vadd.f32 %v498_v32, %v1418_v55  ;;  %v500_v35 = vpop.f32.mrb[22].mxu0 }
 0x170   : > { %v501_v36 = vadd.f32 %v500_v35, %v1416_v54  ;;  %v502_v37 = vpop.f32.mrb[23].mxu0 }
 0x171   : > { %v985_v4 = vpack.c.bf16 %v499_v34, %v497_v31  ;;  %v503_v38 = vadd.f32 %v502_v37, %v1418_v55 }
 0x173   : > { %802 = vst [vmem:[%s1425_s22 + $0x78] sm:$0xff] %v985_v4  ;;  %v987_v39 = vpack.c.bf16 %v503_v38, %v501_v36 }
 0x175   : > { %804 = vst [vmem:[%s1425_s22 + $0x84] sm:$0xff] %v987_v39  ;;  %v506_v40 = vpop.f32.mrb[24].mxu0 }
 0x176   : > { %v507_v41 = vadd.f32 %v506_v40, %v1416_v54  ;;  %v508_v42 = vpop.f32.mrb[25].mxu0 }
 0x177   : > { %v509_v43 = vadd.f32 %v508_v42, %v1418_v55  ;;  %v510_v44 = vpop.f32.mrb[26].mxu0 }
 0x178   : > { %v511_v45 = vadd.f32 %v510_v44, %v1416_v54  ;;  %v512_v46 = vpop.f32.mrb[27].mxu0 }
 0x179   : > { %v989_v47 = vpack.c.bf16 %v509_v43, %v507_v41  ;;  %v513_v48 = vadd.f32 %v512_v46, %v1418_v55 }
 0x17b   : > { %806 = vst [vmem:[%s1425_s22 + $0x90] sm:$0xff] %v989_v47  ;;  %v991_v49 = vpack.c.bf16 %v513_v48, %v511_v45 }
 0x17d   : > { %808 = vst [vmem:[%s1425_s22 + $0x9c] sm:$0xff] %v991_v49  ;;  %v516_v50 = vpop.f32.mrb[28].mxu0 }
 0x17e   : > { %v517_v51 = vadd.f32 %v516_v50, %v1416_v54  ;;  %v518_v52 = vpop.f32.mrb[29].mxu0 }
 0x17f   : > { %v519_v53 = vadd.f32 %v518_v52, %v1418_v55  ;;  %v520_v56 = vpop.f32.mrb[30].mxu0 }
 0x180   : > { %v521_v57 = vadd.f32 %v520_v56, %v1416_v54  ;;  %v522_v58 = vpop.f32.mrb[31].mxu0 }
 0x181   : > { %v993_v59 = vpack.c.bf16 %v519_v53, %v517_v51  ;;  %v523_v60 = vadd.f32 %v522_v58, %v1418_v55 }
 0x183   : > { %810 = vst [vmem:[%s1425_s22 + $0xa8] sm:$0xff] %v993_v59  ;;  %v995_v61 = vpack.c.bf16 %v523_v60, %v521_v57 }
 0x185   : > { %812 = vst [vmem:[%s1425_s22 + $0xb4] sm:$0xff] %v995_v61 }
 0x186 PF: > { %p14_p6 = scmp.ge.s32.totalorder %s1305_s23, 6   ;;  %s1536_s12 = smov %s1221_s13 }
 0x187   : > { %s1537_s13 = smov %s1225_s14  ;;  %s1538_s14 = smov %s1331_s11 }
 0x188   : > { %s1539_s15 = smov %s1305_s23  ;;  %16 = sbr.rel (!%p14_p6) target bundleno = 4 (0x4), region = 76 }
 0x18f   :  { %838 = vsyncpa [#allocation3], 1 }
 0x190   :  { %840 = vsyncpa [#allocation3 + $0x1], 1 }
 0x191   :  { %841 = vsyncpa [#allocation5], 1 }

// kernel: causal_self_attention_forward.4
= control target key start
LH: loop header
LB: loop body
LE: loop exit
PB: predicated region body
PF: predicated region fallthrough
CT: control target
= control target key end

     0   :  { %s2177_s12 = smov 0   ;;  %s2179_s13 = smov 0   ;;  %s2815_s0 = inlined_call_operand.vmem [shape: bf16[8,256,32], index: 0, kind: input, shape index: {}]   ;;  %s2816_s1 = inlined_call_operand.vmem [shape: bf16[8,256,32], index: 1, kind: input, shape index: {}]   ;;  %s2817_s2 = inlined_call_operand.vmem [shape: bf16[8,256,32], index: 2, kind: input, shape index: {}]   ;;  %s2818_s3 = inlined_call_operand.vmem [shape: bf16[8,256,32], index: 3, kind: output, shape index: {}]  }
   0x1   :  { %s2181_s14 = smov 0   ;;  %s2183_s15 = smov 0  }
   0x2   :  { %s2185_s16 = smov 0   ;;  %s2187_s17 = smov 0  }
   0x3   :  { %s2189_s18 = smov 0  }
   0x4 LB: > { %s25_s19 = sadd.s32 1, %s2139_s15  ;;  %s28_s20 = sadd.s32 1, %s2143_s16  ;;  %s2151_s18 = sphi %s2189_s18, %s13_s18   ;;  %s2147_s17 = sphi %s2187_s17, %s2824_s17   ;;  %s2143_s16 = sphi %s2185_s16, %s2823_s16   ;;  %s2139_s15 = sphi %s2183_s15, %s2822_s15   ;;  %s2135_s14 = sphi %s2181_s14, %s2821_s14   ;;  %s2131_s13 = sphi %s2179_s13, %s2820_s13   ;;  %s2127_s12 = sphi %s2177_s12, %s2819_s12  }
   0x5   : > { %p26_p0 = scmp.ge.s32.totalorder %s25_s19, 2  ;;  %p1725_p1 = scmp.ge.s32.totalorder %s2151_s18, 1 }
   0x6   : > { %p199_p2 = scmp.lt.s32.totalorder %s2151_s18, 33  ;;  %s32_s21 = sadd.s32 1, %s2147_s17 }
   0x7   : > { %s2826_s19 = smov (%p26_p0, %s25_s19), 0  ;;  %s2828_s20 = smov (!%p26_p0, %s28_s20), %s2143_s16 }
   0x8   : > { %p200_p3 = pnand %p1725_p1, %p199_p2  ;;  %p30_p4 = scmp.ge.s32.totalorder %s2828_s20, 2 }
   0x9   : > { %s1726_s22 = sshll.u32 (!%p200_p3), %s2131_s13, 4  ;;  %p250_p6 = scmp.lt.s32.totalorder (!%p200_p3), %s2135_s14, 7 }
   0xa   : > { %s2830_s20 = smov (%p30_p4, %s2828_s20), 0  ;;  %s2832_s21 = smov (!%p30_p4, %s32_s21), %s2147_s17 }
   0xb   : > { %p34_p5 = scmp.ge.s32.totalorder %s2832_s21, 8  ;;  %203 = sbr.rel (%p200_p3) target bundleno = 1048 (0x418), region = 32 }
   0xc   : > { %p252_p7 = scmp.lt.s32.totalorder (!%p200_p3), %s1726_s22, 31  ;;  %s1729_s23 = sshll.u32 (!%p200_p3), %s2127_s12, 4 }
   0xd   : > { %s2834_s21 = smov (%p34_p5, %s2832_s21), 0  ;;  %p262_p8 = scmp.lt.s32.totalorder (!%p200_p3), %s1729_s23, 31 }
   0xe   : > { %p1738_p9 = scmp.ne.s32.totalorder (!%p200_p3), %s2127_s12, 0 }
  0x12   : > { %s2836_s14 = smov (!%p250_p6, %s2135_s14), 7  ;;  %s2838_s22 = smov (!%p252_p7, %s1726_s22), 31 }
  0x13   : > { %s1727_s24 = sshll.u32 %s2836_s14, 5  ;;  %s2840_s23 = smov (!%p262_p8, %s1729_s23), 31  ;;  %vm294_vm0 = vcmask (!%p1738_p9), 7168   ;;  %vm327_vm1 = vcmask (!%p1738_p9), 261120   ;;  %v2153_v0 = vmov (!%p1738_p9), -1e+30  }
  0x14   : > { %s255_s25 = sadd.s32 %s1727_s24, %s2838_s22  ;;  %s265_s6 = sadd.s32 %s1727_s24, %s2840_s23  ;;  %295 = vst.msk [vmem:[#allocation2] sm:$0xff] (!%p1738_p9), %vm294_vm0, %v2153_v0  ;;  %296 = vst.msk [vmem:[#allocation2 + $0x8] sm:$0xff] (!%p1738_p9), %vm294_vm0, %v2153_v0  ;;  %v2154_v1 = vmov (!%p1738_p9), 0.0  }
  0x15   : > { %s1728_s26 = sshll.u32 %s255_s25, 2  ;;  %s1731_s7 = sshll.u32 %s265_s6, 2  ;;  %297 = vst.msk [vmem:[#allocation2 + $0x10] sm:$0xff] (!%p1738_p9), %vm294_vm0, %v2153_v0  ;;  %298 = vst.msk [vmem:[#allocation2 + $0x18] sm:$0xff] (!%p1738_p9), %vm294_vm0, %v2153_v0 }
  0x16   : > { %s2228_s29 = scalar_lea.vmem %s2815_s0, %s1728_s26  ;;  %s2233_s5 = scalar_lea.vmem %s2818_s3, %s1728_s26  ;;  %299 = vst.msk [vmem:[#allocation2 + $0x20] sm:$0xff] (!%p1738_p9), %vm294_vm0, %v2153_v0  ;;  %300 = vst.msk [vmem:[#allocation2 + $0x28] sm:$0xff] (!%p1738_p9), %vm294_vm0, %v2153_v0 }
  0x17   : > { %s2238_s10 = scalar_lea.vmem %s2816_s1, %s1731_s7  ;;  %s2243_s22 = scalar_lea.vmem %s2817_s2, %s1731_s7  ;;  %301 = vst.msk [vmem:[#allocation2 + $0x30] sm:$0xff] (!%p1738_p9), %vm294_vm0, %v2153_v0  ;;  %302 = vst.msk [vmem:[#allocation2 + $0x38] sm:$0xff] (!%p1738_p9), %vm294_vm0, %v2153_v0 }
  0x18   : > { %293 = sbr.rel (%p1738_p9) target bundleno = 44 (0x2c), region = 36  ;;  %303 = vst.msk [vmem:[#allocation2 + $0x40] sm:$0xff] (!%p1738_p9), %vm294_vm0, %v2153_v0  ;;  %304 = vst.msk [vmem:[#allocation2 + $0x48] sm:$0xff] (!%p1738_p9), %vm294_vm0, %v2153_v0 }
  0x19   : > { %305 = vst.msk [vmem:[#allocation2 + $0x50] sm:$0xff] (!%p1738_p9), %vm294_vm0, %v2153_v0  ;;  %306 = vst.msk [vmem:[#allocation2 + $0x58] sm:$0xff] (!%p1738_p9), %vm294_vm0, %v2153_v0 }
  0x1a   : > { %307 = vst.msk [vmem:[#allocation2 + $0x60] sm:$0xff] (!%p1738_p9), %vm294_vm0, %v2153_v0  ;;  %308 = vst.msk [vmem:[#allocation2 + $0x68] sm:$0xff] (!%p1738_p9), %vm294_vm0, %v2153_v0 }
  0x1b   : > { %309 = vst.msk [vmem:[#allocation2 + $0x70] sm:$0xff] (!%p1738_p9), %vm294_vm0, %v2153_v0  ;;  %310 = vst.msk [vmem:[#allocation2 + $0x78] sm:$0xff] (!%p1738_p9), %vm294_vm0, %v2153_v0 }
  0x1c   : > { %311 = vst.msk [vmem:[#allocation3] sm:$0xff] (!%p1738_p9), %vm294_vm0, %v2154_v1  ;;  %312 = vst.msk [vmem:[#allocation3 + $0x8] sm:$0xff] (!%p1738_p9), %vm294_vm0, %v2154_v1 }
  0x1d   : > { %313 = vst.msk [vmem:[#allocation3 + $0x10] sm:$0xff] (!%p1738_p9), %vm294_vm0, %v2154_v1  ;;  %314 = vst.msk [vmem:[#allocation3 + $0x18] sm:$0xff] (!%p1738_p9), %vm294_vm0, %v2154_v1 }
  0x1e   : > { %315 = vst.msk [vmem:[#allocation3 + $0x20] sm:$0xff] (!%p1738_p9), %vm294_vm0, %v2154_v1  ;;  %316 = vst.msk [vmem:[#allocation3 + $0x28] sm:$0xff] (!%p1738_p9), %vm294_vm0, %v2154_v1 }
  0x1f   : > { %317 = vst.msk [vmem:[#allocation3 + $0x30] sm:$0xff] %vm294_vm0, %v2154_v1  ;;  %318 = vst.msk [vmem:[#allocation3 + $0x38] sm:$0xff] %vm294_vm0, %v2154_v1 }
  0x20   : > { %319 = vst.msk [vmem:[#allocation3 + $0x40] sm:$0xff] %vm294_vm0, %v2154_v1  ;;  %320 = vst.msk [vmem:[#allocation3 + $0x48] sm:$0xff] %vm294_vm0, %v2154_v1 }
  0x21   : > { %321 = vst.msk [vmem:[#allocation3 + $0x50] sm:$0xff] %vm294_vm0, %v2154_v1  ;;  %322 = vst.msk [vmem:[#allocation3 + $0x58] sm:$0xff] %vm294_vm0, %v2154_v1 }
  0x22   : > { %323 = vst.msk [vmem:[#allocation3 + $0x60] sm:$0xff] %vm294_vm0, %v2154_v1  ;;  %324 = vst.msk [vmem:[#allocation3 + $0x68] sm:$0xff] %vm294_vm0, %v2154_v1 }
  0x23   : > { %325 = vst.msk [vmem:[#allocation3 + $0x70] sm:$0xff] %vm294_vm0, %v2154_v1  ;;  %326 = vst.msk [vmem:[#allocation3 + $0x78] sm:$0xff] %vm294_vm0, %v2154_v1 }
  0x24   : > { %328 = vst.msk [vmem:[#allocation4] sm:$0xff] %vm327_vm1, %v2154_v1  ;;  %329 = vst.msk [vmem:[#allocation4 + $0x8] sm:$0xff] %vm327_vm1, %v2154_v1 }
  0x25   : > { %330 = vst.msk [vmem:[#allocation4 + $0x10] sm:$0xff] %vm327_vm1, %v2154_v1  ;;  %331 = vst.msk [vmem:[#allocation4 + $0x18] sm:$0xff] %vm327_vm1, %v2154_v1 }
  0x26   : > { %332 = vst.msk [vmem:[#allocation4 + $0x20] sm:$0xff] %vm327_vm1, %v2154_v1  ;;  %333 = vst.msk [vmem:[#allocation4 + $0x28] sm:$0xff] %vm327_vm1, %v2154_v1 }
  0x27   : > { %334 = vst.msk [vmem:[#allocation4 + $0x30] sm:$0xff] %vm327_vm1, %v2154_v1  ;;  %335 = vst.msk [vmem:[#allocation4 + $0x38] sm:$0xff] %vm327_vm1, %v2154_v1 }
  0x28   : > { %336 = vst.msk [vmem:[#allocation4 + $0x40] sm:$0xff] %vm327_vm1, %v2154_v1  ;;  %337 = vst.msk [vmem:[#allocation4 + $0x48] sm:$0xff] %vm327_vm1, %v2154_v1 }
  0x29   : > { %338 = vst.msk [vmem:[#allocation4 + $0x50] sm:$0xff] %vm327_vm1, %v2154_v1  ;;  %339 = vst.msk [vmem:[#allocation4 + $0x58] sm:$0xff] %vm327_vm1, %v2154_v1 }
  0x2a   : > { %340 = vst.msk [vmem:[#allocation4 + $0x60] sm:$0xff] %vm327_vm1, %v2154_v1  ;;  %341 = vst.msk [vmem:[#allocation4 + $0x68] sm:$0xff] %vm327_vm1, %v2154_v1 }
  0x2b   : > { %342 = vst.msk [vmem:[#allocation4 + $0x70] sm:$0xff] %vm327_vm1, %v2154_v1  ;;  %343 = vst.msk [vmem:[#allocation4 + $0x78] sm:$0xff] %vm327_vm1, %v2154_v1 }
  0x2c PF: > { %p1739_p10 = scmp.gt.s32.totalorder %s2127_s12, %s2131_s13 }
  0x2d   : > { %v1975_v2 = vld [vmem:[%s2238_s10] sm:$0xff] (!%p1739_p10)   ;;  %vm476_vm2 = vcmask (!%p1739_p10), 261120   ;;  %v1976_v3 = vld [vmem:[%s2238_s10 + $0x8] sm:$0xff] (!%p1739_p10)   ;;  %v1977_v5 = vld [vmem:[%s2238_s10 + $0x10] sm:$0xff] (!%p1739_p10)   ;;  %v639_v26 = vlaneseq (!%p1739_p10)  ;;  %s1764_s23 = sshll.u32 (!%p1739_p10), %s2131_s13, 7  ;;  %s1765_s24 = sshll.u32 (!%p1739_p10), %s2127_s12, 7 }
  0x2e   : > { %347 = sbr.rel (%p1739_p10) target bundleno = 873 (0x369), region = 40  ;;  %1905 = vmatprep.subr.msk.bf16.mxu0 (!%p1739_p10), %vm476_vm2, %v1975_v2  ;;  %v502_v4 = vsel (!%p1739_p10), %vm476_vm2, %v1975_v2, 0  ;;  %v505_v6 = vsel (!%p1739_p10), %vm476_vm2, %v1976_v3, 0  ;;  %v1983_v7 = vld [vmem:[%s2228_s29] sm:$0xff] (!%p1739_p10)   ;;  %v508_v8 = vsel (!%p1739_p10), %vm476_vm2, %v1977_v5, 0  ;;  %v1978_v9 = vld [vmem:[%s2238_s10 + $0x18] sm:$0xff] (!%p1739_p10)   ;;  %v2341_v30 = vstv (!%p1739_p10), %s1764_s23 }
  0x2f   : > { %1842 = vmatpush3.bf16.xpose.msra.mxu0 (!%p1739_p10), %v502_v4  ;;  %1857 = vmatprep.mubr.msk.bf16.mxu0 (!%p1739_p10), %vm476_vm2, %v1983_v7  ;;  %v511_v10 = vsel (!%p1739_p10), %vm476_vm2, %v1978_v9, 0  ;;  %v1979_v11 = vld [vmem:[%s2238_s10 + $0x20] sm:$0xff] (!%p1739_p10)   ;;  %v1980_v13 = vld [vmem:[%s2238_s10 + $0x28] sm:$0xff] (!%p1739_p10)   ;;  %v1981_v15 = vld [vmem:[%s2238_s10 + $0x30] sm:$0xff] (!%p1739_p10)   ;;  %v2336_v27 = vshrl.u32 (!%p1739_p10), %v639_v26, 7  ;;  %v675_v29 = vand.u32 (!%p1739_p10), 127, %v639_v26  ;;  %v676_v31 = vstv (!%p1739_p10), %s1765_s24 }
  0x30   : > { %1906 = vmatprep.subr.msk.bf16.mxu0 (!%p1739_p10), %vm476_vm2, %v1976_v3  ;;  %v514_v12 = vsel (!%p1739_p10), %vm476_vm2, %v1979_v11, 0  ;;  %v517_v14 = vsel (!%p1739_p10), %vm476_vm2, %v1980_v13, 0  ;;  %v520_v16 = vsel (!%p1739_p10), %vm476_vm2, %v1981_v15, 0  ;;  %v1982_v17 = vld [vmem:[%s2238_s10 + $0x38] sm:$0xff] (!%p1739_p10)   ;;  %v1984_v19 = vld [vmem:[%s2228_s29 + $0x8] sm:$0xff] (!%p1739_p10)   ;;  %v1985_v20 = vld [vmem:[%s2228_s29 + $0x10] sm:$0xff] (!%p1739_p10)  }
  0x31   : > { %v523_v18 = vsel (!%p1739_p10), %vm476_vm2, %v1982_v17, 0  ;;  %v1986_v21 = vld [vmem:[%s2228_s29 + $0x18] sm:$0xff] (!%p1739_p10)   ;;  %v1987_v22 = vld [vmem:[%s2228_s29 + $0x20] sm:$0xff] (!%p1739_p10)   ;;  %v1988_v23 = vld [vmem:[%s2228_s29 + $0x28] sm:$0xff] (!%p1739_p10)   ;;  %v642_v28 = vadd.s32 (!%p1739_p10), 16, %v2336_v27  ;;  %v2344_v33 = vadd.s32 (!%p1739_p10), %v676_v31, %v675_v29  ;;  %v643_v34 = vadd.s32 (!%p1739_p10), 24, %v2336_v27 }
  0x32   : > { %v1989_v24 = vld [vmem:[%s2228_s29 + $0x30] sm:$0xff] (!%p1739_p10)   ;;  %v1990_v25 = vld [vmem:[%s2228_s29 + $0x38] sm:$0xff] (!%p1739_p10)   ;;  %v657_v35 = vadd.s32 (!%p1739_p10), %v2341_v30, %v2336_v27  ;;  %v641_v36 = vadd.s32 (!%p1739_p10), 8, %v2336_v27  ;;  %v644_v42 = vadd.s32 (!%p1739_p10), 32, %v2336_v27  ;;  %v647_v45 = vadd.s32 (!%p1739_p10), 56, %v2336_v27 }
  0x33   : > { %v659_v32 = vadd.s32 (!%p1739_p10), %v2341_v30, %v642_v28  ;;  %v660_v38 = vadd.s32 (!%p1739_p10), %v2341_v30, %v643_v34  ;;  %v646_v52 = vadd.s32 (!%p1739_p10), 48, %v2336_v27  ;;  %v645_v54 = vadd.s32 (!%p1739_p10), 40, %v2336_v27 }
  0x34   : > { %vm678_vm4 = vcmp.ge.s32.totalorder (!%p1739_p10), %v657_v35, %v2344_v33  ;;  %v658_v41 = vadd.s32 (!%p1739_p10), %v2341_v30, %v641_v36  ;;  %v661_v51 = vadd.s32 (!%p1739_p10), %v2341_v30, %v644_v42  ;;  %v664_v53 = vadd.s32 (!%p1739_p10), %v2341_v30, %v647_v45 }
  0x35   : > { %vm680_vm3 = vcmp.ge.s32.totalorder %v659_v32, %v2344_v33  ;;  %vm681_vm5 = vcmp.ge.s32.totalorder %v660_v38, %v2344_v33  ;;  %v663_v59 = vadd.s32 %v2341_v30, %v646_v52  ;;  %v648_v60 = vadd.s32 64, %v2336_v27  ;;  %v1992_v52 = vld [vmem:[%s2243_s22 + $0x8] sm:$0xff]  }
  0x36   : > { %vm679_vm6 = vcmp.ge.s32.totalorder %v658_v41, %v2344_v33  ;;  %vm682_vm7 = vcmp.ge.s32.totalorder %v661_v51, %v2344_v33  ;;  %vm685_vm8 = vcmp.ge.s32.totalorder %v664_v53, %v2344_v33  ;;  %v662_v63 = vadd.s32 %v2341_v30, %v645_v54  ;;  %v1991_v51 = vld [vmem:[%s2243_s22] sm:$0xff]  }
  0x37   : > { %1844 = vmatpush3.bf16.xpose.msra.mxu0 %v505_v6  ;;  %v651_v0 = vadd.s32 88, %v2336_v27  ;;  %v650_v3 = vadd.s32 80, %v2336_v27  ;;  %v649_v6 = vadd.s32 72, %v2336_v27  ;;  %vm684_vm9 = vcmp.ge.s32.totalorder %v663_v59, %v2344_v33  ;;  %1873 = vmatprep.subr.bf16.mxu1 %v1991_v51  ;;  %v2446_v53 = vld [vmem:[#allocation2] sm:$0xff] }
  0x38   : > { %1907 = vmatprep.subr.msk.bf16.mxu0 %vm476_vm2, %v1977_v5  ;;  %vm683_vm10 = vcmp.ge.s32.totalorder %v662_v63, %v2344_v33  ;;  %v653_v29 = vadd.s32 104, %v2336_v27  ;;  %1874 = vmatpush3.bf16.msra.mxu1 %v1991_v51 }
  0x39   : > { %1875 = vmatprep.subr.bf16.mxu1 %v1992_v52 }
  0x3c   : > { %1876 = vmatpush3.bf16.msra.mxu1 %v1992_v52 }
  0x3f   : > { %1846 = vmatpush3.bf16.xpose.msra.mxu0 %v508_v8 }
  0x40   : > { %1908 = vmatprep.subr.msk.bf16.mxu0 %vm476_vm2, %v1978_v9  ;;  %v665_v9 = vadd.s32 %v2341_v30, %v648_v60  ;;  %v2454_v60 = vld [vmem:[#allocation2 + $0x18] sm:$0xff] }
  0x42   : > { %vm686_vm11 = vcmp.ge.s32.totalorder %v665_v9, %v2344_v33 }
  0x47   : > { %1848 = vmatpush3.bf16.xpose.msra.mxu0 %v511_v10  ;;  %v668_v10 = vadd.s32 %v2341_v30, %v651_v0 }
  0x48   : > { %1909 = vmatprep.subr.msk.bf16.mxu0 %vm476_vm2, %v1979_v11  ;;  %v667_v11 = vadd.s32 %v2341_v30, %v650_v3  ;;  %v2474_v3 = vld [vmem:[#allocation2 + $0x20] sm:$0xff] }
  0x49   : > { %vm689_vm12 = vcmp.ge.s32.totalorder %v668_v10, %v2344_v33 }
  0x4a   : > { %vm688_vm13 = vcmp.ge.s32.totalorder %v667_v11, %v2344_v33 }
  0x4f   : > { %1850 = vmatpush3.bf16.xpose.msra.mxu0 %v514_v12 }
  0x50   : > { %1910 = vmatprep.subr.msk.bf16.mxu0 %vm476_vm2, %v1980_v13 }
  0x57   : > { %1852 = vmatpush3.bf16.xpose.msra.mxu0 %v517_v14  ;;  %v666_v14 = vadd.s32 %v2341_v30, %v649_v6  ;;  %v2479_v6 = vld [vmem:[#allocation2 + $0x38] sm:$0xff] }
  0x58   : > { %1911 = vmatprep.subr.msk.bf16.mxu0 %vm476_vm2, %v1981_v15 }
  0x59   : > { %vm687_vm14 = vcmp.ge.s32.totalorder %v666_v14, %v2344_v33  ;;  %v1995_v14 = vld [vmem:[%s2243_s22 + $0x20] sm:$0xff]  }
  0x5f   : > { %1854 = vmatpush3.bf16.xpose.msra.mxu0 %v520_v16 }
  0x60   : > { %1912 = vmatprep.subr.msk.bf16.mxu0 %vm476_vm2, %v1982_v17  ;;  %v655_v17 = vadd.s32 120, %v2336_v27 }
  0x62   : > { %v672_v35 = vadd.s32 %v2341_v30, %v655_v17 }
  0x64   : > { %vm693_vm0 = vcmp.ge.s32.totalorder %v672_v35, %v2344_v33  ;;  %v1997_v35 = vld [vmem:[%s2243_s22 + $0x30] sm:$0xff]  }
  0x67   : > { %1856 = vmatpush3.bf16.xpose.msra.mxu0 %v523_v18  ;;  %v652_v18 = vadd.s32 96, %v2336_v27 }
  0x69   : > { %v669_v32 = vadd.s32 %v2341_v30, %v652_v18 }
  0x6b   : > { %vm690_vm15 = vcmp.ge.s32.totalorder %v669_v32, %v2344_v33  ;;  %v2519_v32 = vld [vmem:[#allocation2 + $0x50] sm:$0xff] }
  0x6e   : > { %1858 = vmatmul.mubr.msk.bf16.vlgmr.msra.gmra.mrb[0].mxu0 %vm476_vm2, %v1984_v19 }
  0x6f   : > { %1861 = vmatprep.mubr.msk.bf16.mxu0 %vm476_vm2, %v1985_v20 }
  0x76   : > { %1862 = vmatmul.mubr.msk.bf16.gmra.mrb[4].mxu0 %vm476_vm2, %v1986_v21 }
  0x77   : > { %1865 = vmatprep.mubr.msk.bf16.mxu0 %vm476_vm2, %v1987_v22 }
  0x7e   : > { %1866 = vmatmul.mubr.msk.bf16.gmra.mrb[8].mxu0 %vm476_vm2, %v1988_v23 }
  0x7f   : > { %1869 = vmatprep.mubr.msk.bf16.mxu0 %vm476_vm2, %v1989_v24  ;;  %v654_v24 = vadd.s32 112, %v2336_v27 }
  0x86   : > { %1870 = vmatmul.mubr.msk.bf16.gmra.mrb[12].mxu0 %vm476_vm2, %v1990_v25  ;;  %v2155_v25 = vmov 0  }
  0x87   : > { %1974 = vset.pattern.permute.xlu1 %v2155_v25  ;;  %1973 = vset.pattern.permute.xlu0 %v2155_v25 }
 0x141   : > { %v1859_v37 = vpop.f32.mrb[0].mxu0 }
 0x142   : > { %v624_v39 = vmul.f32 0.17677669, %v1859_v37  ;;  %v559_v40 = vpop.f32.mrb[1].mxu0  ;;  %v671_v37 = vadd.s32 %v2341_v30, %v654_v24 }
 0x143   : > { %v622_v43 = vmul.f32 0.17677669, %v559_v40  ;;  %v1860_v44 = vpop.f32.mrb[2].mxu0 }
 0x144   : > { %v625_v46 = vmul.f32 0.17677669, %v1860_v44  ;;  %v562_v47 = vpop.f32.mrb[3].mxu0  ;;  %v2356_v48 = vsel %vm680_vm3, %v624_v39, -1e+30  ;;  %v670_v39 = vadd.s32 %v2341_v30, %v653_v29  ;;  %vm692_vm1 = vcmp.ge.s32.totalorder %v671_v37, %v2344_v33  ;;  %v2525_v37 = vld [vmem:[#allocation2 + $0x48] sm:$0xff] }
 0x145   : > { %v623_v49 = vmul.f32 0.17677669, %v562_v47  ;;  %730 = vmax.xlane.f32.xlu1 %v2356_v48  ;;  %v2359_v50 = vsel %vm678_vm4, %v622_v43, -1e+30  ;;  %vm1030_vm4 = vcmask 7168  }
 0x146   : > { %726 = vmax.xlane.f32.xlu0 %v2359_v50  ;;  %v2368_v55 = vsel %vm681_vm5, %v625_v46, -1e+30  ;;  %vm691_vm3 = vcmp.ge.s32.totalorder %v670_v39, %v2344_v33  ;;  %v2444_v33 = vld [vmem:[#allocation2 + $0x10] sm:$0xff] }
 0x147   : > { %v2371_v57 = vsel %vm679_vm6, %v623_v49, -1e+30 }
 0x149   : > { %732 = vmax.xlane.f32.xlu1 %v2368_v55  ;;  %v1863_v56 = vpop.f32.mrb[4].mxu0 }
 0x14a   : > { %728 = vmax.xlane.f32.xlu0 %v2371_v57  ;;  %v575_v58 = vpop.f32.mrb[5].mxu0  ;;  %v628_v4 = vmul.f32 0.17677669, %v1863_v56 }
 0x14b   : > { %v626_v61 = vmul.f32 0.17677669, %v575_v58  ;;  %v1864_v62 = vpop.f32.mrb[6].mxu0 }
 0x14c   : > { %v629_v1 = vmul.f32 0.17677669, %v1864_v62  ;;  %v578_v2 = vpop.f32.mrb[7].mxu0  ;;  %v2393_v13 = vsel %vm684_vm9, %v628_v4, -1e+30  ;;  %v1993_v62 = vld [vmem:[%s2243_s22 + $0x10] sm:$0xff]  }
 0x14d   : > { %v2381_v5 = vsel %vm682_vm7, %v626_v61, -1e+30  ;;  %v627_v7 = vmul.f32 0.17677669, %v578_v2  ;;  %v2459_v61 = vld [vmem:[#allocation2 + $0x8] sm:$0xff]  ;;  %1877 = vmatprep.subr.bf16.mxu1 %v1993_v62  ;;  %v1994_v4 = vld [vmem:[%s2243_s22 + $0x18] sm:$0xff]  }
 0x14e   : > { %734 = vmax.xlane.f32.xlu0 %v2381_v5  ;;  %v2385_v8 = vsel %vm685_vm8, %v629_v1, -1e+30  ;;  %1878 = vmatpush3.bf16.msra.mxu1 %v1993_v62  ;;  %v723_v62 = vld [vmem:[#allocation2 + $0x68] sm:$0xff] }
 0x14f   : > { %740 = vmax.xlane.f32.xlu1 %v2385_v8  ;;  %v2397_v16 = vsel %vm683_vm10, %v627_v7, -1e+30  ;;  %1879 = vmatprep.subr.bf16.mxu1 %v1994_v4 }
 0x151   : > { %v1867_v12 = vpop.f32.mrb[8].mxu0 }
 0x152   : > { %738 = vmax.xlane.f32.xlu0 %v2393_v13  ;;  %v591_v15 = vpop.f32.mrb[9].mxu0  ;;  %v632_v19 = vmul.f32 0.17677669, %v1867_v12  ;;  %1880 = vmatpush3.bf16.msra.mxu1 %v1994_v4  ;;  %v2488_v12 = vld [vmem:[#allocation2 + $0x30] sm:$0xff] }
 0x153   : > { %v630_v20 = vmul.f32 0.17677669, %v591_v15  ;;  %736 = vmax.xlane.f32.xlu1 %v2397_v16  ;;  %v1868_v21 = vpop.f32.mrb[10].mxu0  ;;  %v2493_v15 = vld [vmem:[#allocation2 + $0x28] sm:$0xff]  ;;  %1881 = vmatprep.subr.bf16.mxu1 %v1995_v14 }
 0x154   : > { %v633_v22 = vmul.f32 0.17677669, %v1868_v21  ;;  %v594_v23 = vpop.f32.mrb[11].mxu0  ;;  %v2417_v34 = vsel %vm688_vm13, %v632_v19, -1e+30  ;;  %v2503_v21 = vld [vmem:[#allocation2 + $0x40] sm:$0xff] }
 0x155   : > { %v631_v26 = vmul.f32 0.17677669, %v594_v23  ;;  %v2408_v28 = vsel %vm686_vm11, %v630_v20, -1e+30  ;;  %v2509_v23 = vld [vmem:[#allocation2 + $0x58] sm:$0xff] }
 0x156   : > { %v2412_v31 = vsel %vm689_vm12, %v633_v22, -1e+30  ;;  %742 = vmax.xlane.f32.xlu0 %v2408_v28  ;;  %1882 = vmatpush3.bf16.msra.mxu1 %v1995_v14  ;;  %v1996_v22 = vld [vmem:[%s2243_s22 + $0x28] sm:$0xff]  }
 0x157   : > { %748 = vmax.xlane.f32.xlu1 %v2412_v31  ;;  %v2420_v36 = vsel %vm687_vm14, %v631_v26, -1e+30  ;;  %1883 = vmatprep.subr.bf16.mxu1 %v1996_v22 }
 0x159   : > { %v1871_v38 = vpop.f32.mrb[12].mxu0 }
 0x15a   : > { %v607_v27 = vpop.f32.mrb[13].mxu0  ;;  %746 = vmax.xlane.f32.xlu0 %v2417_v34  ;;  %v636_v40 = vmul.f32 0.17677669, %v1871_v38  ;;  %1884 = vmatpush3.bf16.msra.mxu1 %v1996_v22 }
 0x15b   : > { %v634_v41 = vmul.f32 0.17677669, %v607_v27  ;;  %744 = vmax.xlane.f32.xlu1 %v2420_v36  ;;  %v1872_v42 = vpop.f32.mrb[14].mxu0  ;;  %1885 = vmatprep.subr.bf16.mxu1 %v1997_v35 }
 0x15c   : > { %v637_v43 = vmul.f32 0.17677669, %v1872_v42  ;;  %v610_v44 = vpop.f32.mrb[15].mxu0  ;;  %v2436_v47 = vsel %vm692_vm1, %v636_v40, -1e+30  ;;  %v2537_v42 = vld [vmem:[#allocation2 + $0x60] sm:$0xff] }
 0x15d   : > { %v635_v45 = vmul.f32 0.17677669, %v610_v44  ;;  %v2429_v30 = vsel %vm690_vm15, %v634_v41, -1e+30  ;;  %v2543_v44 = vld [vmem:[#allocation2 + $0x78] sm:$0xff] }
 0x15e   : > { %v2432_v46 = vsel %vm693_vm0, %v637_v43, -1e+30  ;;  %750 = vmax.xlane.f32.xlu0 %v2429_v30  ;;  %1886 = vmatpush3.bf16.msra.mxu1 %v1997_v35  ;;  %v1998_v43 = vld [vmem:[%s2243_s22 + $0x38] sm:$0xff]  }
 0x15f   : > { %756 = vmax.xlane.f32.xlu1 %v2432_v46  ;;  %v2438_v49 = vsel %vm691_vm3, %v635_v45, -1e+30  ;;  %1887 = vmatprep.subr.bf16.mxu1 %v1998_v43 }
 0x162   : > { %754 = vmax.xlane.f32.xlu0 %v2436_v47  ;;  %1888 = vmatpush3.bf16.msra.mxu1 %v1998_v43 }
 0x163   : > { %752 = vmax.xlane.f32.xlu1 %v2438_v49 }
 0x1d2   : > { %v731_v54 = vpop.xlane.xlu1 %730 }
 0x1d3   : > { %v2449_v56 = vmax.f32 %v2444_v33, %v731_v54  ;;  %v727_v58 = vpop.xlane.xlu0 %726 }
 0x1d4   : > { %v2452_v59 = vmax.f32 %v2446_v53, %v727_v58 }
 0x1d5   : > { %1346 = vst.msk [vmem:[#allocation2 + $0x10] sm:$0xff] %vm1030_vm4, %v2449_v56  ;;  %834 = vperm.xlu1 %1974, %v2449_v56  }
 0x1d6   : > { %1344 = vst.msk [vmem:[#allocation2] sm:$0xff] %vm1030_vm4, %v2452_v59  ;;  %v733_v63 = vpop.xlane.xlu1 %732  ;;  %824 = vperm.xlu0 %1973, %v2452_v59   ;;  %v774_v39 = vsub.f32 %v2446_v53, %v2452_v59  ;;  %v2556_v59 = vld [vmem:[#allocation2 + $0x70] sm:$0xff] }
 0x1d7   : > { %v2466_v0 = vmax.f32 %v2454_v60, %v733_v63  ;;  %v729_v1 = vpop.xlane.xlu0 %728 }
 0x1d8   : > { %v2469_v2 = vmax.f32 %v2459_v61, %v729_v1  ;;  %v790_v51 = vmul.f32 1.442695, %v774_v39 }
 0x1d9   : > { %1347 = vst.msk [vmem:[#allocation2 + $0x18] sm:$0xff] %vm1030_vm4, %v2466_v0  ;;  %839 = vperm.xlu1 %1974, %v2466_v0   ;;  %v777_v52 = vsub.f32 %v2454_v60, %v2466_v0 }
 0x1da   : > { %1345 = vst.msk [vmem:[#allocation2 + $0x8] sm:$0xff] %vm1030_vm4, %v2469_v2  ;;  %v775_v63 = vsub.f32 %v2459_v61, %v2469_v2  ;;  %1999 = vpow2.f32 %v790_v51 }
 0x1db   : > { %v735_v7 = vpop.xlane.xlu0 %734  ;;  %v796_v1 = vmul.f32 1.442695, %v777_v52 }
 0x1dc   : > { %v2482_v9 = vmax.f32 %v2474_v3, %v735_v7  ;;  %v741_v10 = vpop.xlane.xlu1 %740 }
 0x1dd   : > { %v2485_v11 = vmax.f32 %v2479_v6, %v741_v10  ;;  %829 = vperm.xlu1 %1974, %v2469_v2   ;;  %v776_v2 = vsub.f32 %v2444_v33, %v2449_v56  ;;  %2001 = vpow2.f32 %v796_v1 }
 0x1de   : > { %1348 = vst.msk [vmem:[#allocation2 + $0x20] sm:$0xff] %vm1030_vm4, %v2482_v9  ;;  %v778_v22 = vsub.f32 %v2474_v3, %v2482_v9 }
 0x1df   : > { %1351 = vst.msk [vmem:[#allocation2 + $0x38] sm:$0xff] %vm1030_vm4, %v2485_v11  ;;  %v739_v17 = vpop.xlane.xlu0 %738 }
 0x1e0   : > { %v2498_v18 = vmax.f32 %v2488_v12, %v739_v17  ;;  %v737_v19 = vpop.xlane.xlu1 %736  ;;  %v792_v17 = vmul.f32 1.442695, %v775_v63 }
 0x1e1   : > { %v2501_v20 = vmax.f32 %v2493_v15, %v737_v19 }
 0x1e2   : > { %1350 = vst.msk [vmem:[#allocation2 + $0x30] sm:$0xff] %vm1030_vm4, %v2498_v18  ;;  %854 = vperm.xlu1 %1974, %v2498_v18   ;;  %2003 = vpow2.f32 %v792_v17 }
 0x1e3   : > { %1349 = vst.msk [vmem:[#allocation2 + $0x28] sm:$0xff] %vm1030_vm4, %v2501_v20  ;;  %v743_v24 = vpop.xlane.xlu0 %742  ;;  %v779_v4 = vsub.f32 %v2493_v15, %v2501_v20  ;;  %v781_v15 = vsub.f32 %v2479_v6, %v2485_v11  ;;  %v798_v6 = vmul.f32 1.442695, %v778_v22 }
 0x1e4   : > { %v749_v25 = vpop.xlane.xlu1 %748  ;;  %v2514_v26 = vmax.f32 %v2503_v21, %v743_v24  ;;  %v2589_v56 = vpop.eup %1999 }
 0x1e5   : > { %v2517_v29 = vmax.f32 %v2509_v23, %v749_v25  ;;  %v800_v19 = vmul.f32 1.442695, %v779_v4  ;;  %v804_v24 = vmul.f32 1.442695, %v781_v15 }
 0x1e6   : > { %1352 = vst.msk [vmem:[#allocation2 + $0x40] sm:$0xff] %vm1030_vm4, %v2514_v26  ;;  %844 = vperm.xlu1 %1974, %v2482_v9  }
 0x1e7   : > { %1355 = vst.msk [vmem:[#allocation2 + $0x58] sm:$0xff] %vm1030_vm4, %v2517_v29  ;;  %v747_v38 = vpop.xlane.xlu0 %746  ;;  %2005 = vpow2.f32 %v800_v19  ;;  %v785_v33 = vsub.f32 %v2509_v23, %v2517_v29  ;;  %v2597_v25 = vpop.eup %2001 }
 0x1e8   : > { %v745_v27 = vpop.xlane.xlu1 %744  ;;  %v2532_v40 = vmax.f32 %v2519_v32, %v747_v38 }
 0x1e9   : > { %v2535_v41 = vmax.f32 %v2525_v37, %v745_v27  ;;  %v812_v3 = vmul.f32 1.442695, %v785_v33 }
 0x1ea   : > { %1354 = vst.msk [vmem:[#allocation2 + $0x50] sm:$0xff] %vm1030_vm4, %v2532_v40  ;;  %849 = vperm.xlu1 %1974, %v2501_v20   ;;  %v794_v20 = vmul.f32 1.442695, %v776_v2 }
 0x1eb   : > { %1353 = vst.msk [vmem:[#allocation2 + $0x48] sm:$0xff] %vm1030_vm4, %v2535_v41  ;;  %869 = vperm.xlu0 %1973, %v2535_v41   ;;  %v751_v45 = vpop.xlane.xlu0 %750  ;;  %v783_v9 = vsub.f32 %v2525_v37, %v2535_v41  ;;  %v782_v37 = vsub.f32 %v2503_v21, %v2514_v26 }
 0x1ec   : > { %v757_v53 = vpop.xlane.xlu1 %756  ;;  %v2551_v54 = vmax.f32 %v2537_v42, %v751_v45  ;;  %2007 = vpow2.f32 %v794_v20  ;;  %v2603_v35 = vpop.eup %2003 }
 0x1ed   : > { %v2554_v58 = vmax.f32 %v2543_v44, %v757_v53  ;;  %2009 = vpow2.f32 %v804_v24  ;;  %v806_v41 = vmul.f32 1.442695, %v782_v37 }
 0x1ee   : > { %1356 = vst.msk [vmem:[#allocation2 + $0x60] sm:$0xff] %vm1030_vm4, %v2551_v54  ;;  %859 = vperm.xlu1 %1974, %v2485_v11   ;;  %v780_v11 = vsub.f32 %v2488_v12, %v2498_v18  ;;  %2011 = vpow2.f32 %v798_v6  ;;  %v808_v12 = vmul.f32 1.442695, %v783_v9  ;;  %v786_v43 = vsub.f32 %v2537_v42, %v2551_v54 }
 0x1ef   : > { %v789_v60 = vsub.f32 %v2543_v44, %v2554_v58  ;;  %1359 = vst.msk [vmem:[#allocation2 + $0x78] sm:$0xff] %vm1030_vm4, %v2554_v58  ;;  %879 = vperm.xlu0 %1973, %v2517_v29   ;;  %v755_v0 = vpop.xlane.xlu0 %754  ;;  %v784_v29 = vsub.f32 %v2519_v32, %v2532_v40  ;;  %2013 = vpow2.f32 %v812_v3 }
 0x1f0   : > { %v753_v7 = vpop.xlane.xlu1 %752  ;;  %v2571_v10 = vmax.f32 %v2556_v59, %v755_v0  ;;  %v802_v23 = vmul.f32 1.442695, %v780_v11  ;;  %v814_v45 = vmul.f32 1.442695, %v786_v43 }
 0x1f1   : > { %v771_v14 = vmax.f32 %v723_v62, %v753_v7  ;;  %v2605_v38 = vpop.eup %2005  ;;  %v810_v39 = vmul.f32 1.442695, %v784_v29 }
 0x1f2   : > { %v788_v61 = vsub.f32 %v2556_v59, %v2571_v10  ;;  %1358 = vst.msk [vmem:[#allocation2 + $0x70] sm:$0xff] %vm1030_vm4, %v2571_v10  ;;  %864 = vperm.xlu1 %1974, %v2514_v26   ;;  %2015 = vpow2.f32 %v802_v23 }
 0x1f3   : > { %1357 = vst.msk [vmem:[#allocation2 + $0x68] sm:$0xff] %vm1030_vm4, %v771_v14  ;;  %889 = vperm.xlu0 %1973, %v771_v14   ;;  %v787_v18 = vsub.f32 %v723_v62, %v771_v14  ;;  %2017 = vpow2.f32 %v808_v12 }
 0x1f4   : > { %2019 = vpow2.f32 %v810_v39 }
 0x1f5   : > { %v816_v32 = vmul.f32 1.442695, %v787_v18 }
 0x1f6   : > { %874 = vperm.xlu1 %1974, %v2532_v40   ;;  %v2611_v27 = vpop.eup %2007 }
 0x1f7   : > { %899 = vperm.xlu0 %1973, %v2554_v58   ;;  %v2613_v40 = vpop.eup %2009  ;;  %2021 = vpow2.f32 %v816_v32 }
 0x1f8   : > { %v2619_v21 = vpop.eup %2011  ;;  %2023 = vpow2.f32 %v806_v41 }
 0x1f9   : > { %v2621_v26 = vpop.eup %2013  ;;  %2025 = vpow2.f32 %v814_v45 }
 0x1fa   : > { %884 = vperm.xlu1 %1974, %v2551_v54  }
 0x1fb   : > { %1065 = vperm.xlu0 %1973, %v2589_v56  }
 0x1fc   : > { %v2625_v51 = vpop.eup %2015 }
 0x1fd   : > { %v2627_v52 = vpop.eup %2017 }
 0x1fe   : > { %894 = vperm.xlu1 %1974, %v2571_v10   ;;  %v2631_v42 = vpop.eup %2019 }
 0x1ff   : > { %1080 = vperm.xlu0 %1973, %v2597_v25  }
 0x201   : > { %v2633_v53 = vpop.eup %2021 }
 0x202   : > { %1070 = vperm.xlu1 %1974, %v2603_v35   ;;  %v2637_v54 = vpop.eup %2023 }
 0x203   : > { %1090 = vperm.xlu0 %1973, %v2605_v38   ;;  %v2640_v62 = vpop.eup %2025 }
 0x206   : > { %1075 = vperm.xlu1 %1974, %v2611_v27  }
 0x207   : > { %1100 = vperm.xlu0 %1973, %v2613_v40  }
 0x20a   : > { %1085 = vperm.xlu1 %1974, %v2619_v21  }
 0x20b   : > { %1120 = vperm.xlu0 %1973, %v2621_v26  }
 0x20e   : > { %1095 = vperm.xlu1 %1974, %v2625_v51  }
 0x20f   : > { %1110 = vperm.xlu0 %1973, %v2627_v52  }
 0x212   : > { %1115 = vperm.xlu1 %1974, %v2631_v42  }
 0x213   : > { %1130 = vperm.xlu0 %1973, %v2633_v53  }
 0x216   : > { %1105 = vperm.xlu1 %1974, %v2637_v54  }
 0x21a   : > { %1125 = vperm.xlu1 %1974, %v2640_v62  }
 0x254   : > { %v835_v63 = vpop.permute.xlu1 %834 }
 0x255   : > { %v904_v0 = vsub.f32 %v2356_v48, %v835_v63  ;;  %v825_v1 = vpop.permute.xlu0 %824 }
 0x256   : > { %v902_v4 = vsub.f32 %v2359_v50, %v825_v1 }
 0x257   : > { %v922_v7 = vmul.f32 1.442695, %v904_v0 }
 0x258   : > { %v918_v14 = vmul.f32 1.442695, %v902_v4  ;;  %v840_v2 = vpop.permute.xlu1 %839 }
 0x259   : > { %2027 = vpow2.f32 %v922_v7  ;;  %v905_v17 = vsub.f32 %v2368_v55, %v840_v2 }
 0x25a   : > { %2029 = vpow2.f32 %v918_v14 }
 0x25b   : > { %v924_v15 = vmul.f32 1.442695, %v905_v17 }
 0x25c   : > { %v830_v19 = vpop.permute.xlu1 %829 }
 0x25d   : > { %2031 = vpow2.f32 %v924_v15  ;;  %v903_v20 = vsub.f32 %v2371_v57, %v830_v19 }
 0x25f   : > { %v920_v22 = vmul.f32 1.442695, %v903_v20 }
 0x261   : > { %2033 = vpow2.f32 %v920_v22  ;;  %v855_v24 = vpop.permute.xlu1 %854 }
 0x262   : > { %v908_v48 = vsub.f32 %v2393_v13, %v855_v24 }
 0x263   : > { %v2028_v33 = vpop.eup %2027 }
 0x264   : > { %v2030_v6 = vpop.eup %2029  ;;  %v930_v50 = vmul.f32 1.442695, %v908_v48  ;;  %986 = vadd.xlane.f32.xlu0 %v2028_v33 }
 0x265   : > { %982 = vadd.xlane.f32.xlu1 %v2030_v6  ;;  %v845_v11 = vpop.permute.xlu1 %844 }
 0x266   : > { %2035 = vpow2.f32 %v930_v50  ;;  %v906_v55 = vsub.f32 %v2381_v5, %v845_v11 }
 0x267   : > { %v2032_v3 = vpop.eup %2031 }
 0x268   : > { %v926_v9 = vmul.f32 1.442695, %v906_v55  ;;  %v1160_v32 = vpack.c.bf16 %v2032_v3, %v2028_v33 }
 0x269   : > { %988 = vadd.xlane.f32.xlu1 %v2032_v3  ;;  %v850_v23 = vpop.permute.xlu1 %849 }
 0x26a   : > { %2037 = vpow2.f32 %v926_v9  ;;  %v907_v57 = vsub.f32 %v2397_v16, %v850_v23  ;;  %v870_v29 = vpop.permute.xlu0 %869 }
 0x26b   : > { %v2034_v12 = vpop.eup %2033  ;;  %v911_v37 = vsub.f32 %v2420_v36, %v870_v29 }
 0x26c   : > { %v928_v18 = vmul.f32 1.442695, %v907_v57  ;;  %984 = vadd.xlane.f32.xlu0 %v2034_v12  ;;  %v1159_v13 = vpack.c.bf16 %v2034_v12, %v2030_v6 }
 0x26d   : > { %v860_v39 = vpop.permute.xlu1 %859  ;;  %v936_v63 = vmul.f32 1.442695, %v911_v37 }
 0x26e   : > { %2039 = vpow2.f32 %v928_v18  ;;  %v909_v41 = vsub.f32 %v2385_v8, %v860_v39  ;;  %v880_v5 = vpop.permute.xlu0 %879  ;;  %1889 = vmatprep.mubr.bf16.mxu1 %v1159_v13  ;;  %v818_v39 = vmul.f32 1.442695, %v788_v61 }
 0x26f   : > { %1890 = vmatmul.mubr.bf16.vlgmr.msra.gmra.mrb[0].mxu1 %v1160_v32  ;;  %v913_v16 = vsub.f32 %v2412_v31, %v880_v5  ;;  %v820_v32 = vmul.f32 1.442695, %v789_v60 }
 0x270   : > { %v2036_v43 = vpop.eup %2035  ;;  %v932_v45 = vmul.f32 1.442695, %v909_v41 }
 0x271   : > { %994 = vadd.xlane.f32.xlu0 %v2036_v43  ;;  %v865_v0 = vpop.permute.xlu1 %864  ;;  %v940_v14 = vmul.f32 1.442695, %v913_v16 }
 0x272   : > { %2041 = vpow2.f32 %v932_v45  ;;  %v910_v1 = vsub.f32 %v2408_v28, %v865_v0  ;;  %v890_v4 = vpop.permute.xlu0 %889 }
 0x273   : > { %2043 = vpow2.f32 %v936_v63  ;;  %v915_v8 = vsub.f32 %v2438_v49, %v890_v4 }
 0x274   : > { %v2038_v36 = vpop.eup %2037  ;;  %v934_v7 = vmul.f32 1.442695, %v910_v1 }
 0x275   : > { %990 = vadd.xlane.f32.xlu0 %v2038_v36  ;;  %v875_v2 = vpop.permute.xlu1 %874  ;;  %v944_v20 = vmul.f32 1.442695, %v915_v8 }
 0x276   : > { %2045 = vpow2.f32 %v934_v7  ;;  %v912_v17 = vsub.f32 %v2417_v34, %v875_v2  ;;  %v900_v15 = vpop.permute.xlu0 %899 }
 0x277   : > { %2047 = vpow2.f32 %v940_v14  ;;  %v917_v22 = vsub.f32 %v2432_v46, %v900_v15  ;;  %v950_v14 = vld [vmem:[#allocation3] sm:$0xff] }
 0x278   : > { %v2040_v19 = vpop.eup %2039  ;;  %v938_v31 = vmul.f32 1.442695, %v912_v17  ;;  %v966_v17 = vmul.f32 %v2589_v56, %v950_v14  ;;  %v956_v56 = vld [vmem:[#allocation3 + $0x30] sm:$0xff] }
 0x279   : > { %v885_v28 = vpop.permute.xlu1 %884  ;;  %v1161_v24 = vpack.c.bf16 %v2040_v19, %v2038_v36  ;;  %v948_v6 = vmul.f32 1.442695, %v917_v22  ;;  %v952_v36 = vld [vmem:[#allocation3 + $0x10] sm:$0xff] }
 0x27a   : > { %2049 = vpow2.f32 %v938_v31  ;;  %v914_v48 = vsub.f32 %v2429_v30, %v885_v28  ;;  %v968_v8 = vmul.f32 %v2611_v27, %v952_v36  ;;  %v953_v31 = vld [vmem:[#allocation3 + $0x18] sm:$0xff]  ;;  %v951_v28 = vld [vmem:[#allocation3 + $0x8] sm:$0xff] }
 0x27b   : > { %1893 = vmatprep.mubr.bf16.mxu1 %v1161_v24  ;;  %2051 = vpow2.f32 %v944_v20  ;;  %v969_v22 = vmul.f32 %v2597_v25, %v953_v31 }
 0x27c   : > { %v2042_v33 = vpop.eup %2041  ;;  %v942_v49 = vmul.f32 1.442695, %v914_v48 }
 0x27d   : > { %996 = vadd.xlane.f32.xlu1 %v2042_v33  ;;  %v895_v50 = vpop.permute.xlu1 %894  ;;  %v1162_v34 = vpack.c.bf16 %v2042_v33, %v2036_v43  ;;  %v2044_v55 = vpop.eup %2043  ;;  %v967_v33 = vmul.f32 %v2603_v35, %v951_v28  ;;  %v957_v35 = vld [vmem:[#allocation3 + $0x38] sm:$0xff]  ;;  %v962_v28 = vld [vmem:[#allocation3 + $0x60] sm:$0xff] }
 0x27e   : > { %2053 = vpow2.f32 %v942_v49  ;;  %v916_v11 = vsub.f32 %v2436_v47, %v895_v50  ;;  %v2671_v43 = vpop.permute.xlu0 %1065 }
 0x27f   : > { %1894 = vmatmul.mubr.bf16.gmra.mrb[4].mxu1 %v1162_v34  ;;  %2055 = vpow2.f32 %v948_v6  ;;  %v972_v6 = vmul.f32 %v2625_v51, %v956_v56  ;;  %v954_v34 = vld [vmem:[#allocation3 + $0x20] sm:$0xff] }
 0x280   : > { %v2046_v3 = vpop.eup %2045  ;;  %v946_v46 = vmul.f32 1.442695, %v916_v11  ;;  %v970_v25 = vmul.f32 %v2619_v21, %v954_v34  ;;  %v1048_v34 = vld [vmem:[#allocation4 + $0x8] sm:$0xff] }
 0x281   : > { %992 = vadd.xlane.f32.xlu1 %v2040_v19  ;;  %v1163_v9 = vpack.c.bf16 %v2044_v55, %v2046_v3  ;;  %v2048_v30 = vpop.eup %2047  ;;  %v2673_v45 = vpop.permute.xlu1 %1070 }
 0x282   : > { %2057 = vpow2.f32 %v946_v46  ;;  %v2675_v59 = vpop.permute.xlu0 %1080  ;;  %v973_v46 = vmul.f32 %v2613_v40, %v957_v35  ;;  %v958_v40 = vld [vmem:[#allocation3 + $0x40] sm:$0xff]  ;;  %v1144_v35 = vmul.f32 %v2673_v45, %v1048_v34 }
 0x283   : > { %1897 = vmatprep.mubr.bf16.mxu1 %v1163_v9  ;;  %2059 = vpow2.f32 %v818_v39  ;;  %v959_v39 = vld [vmem:[#allocation3 + $0x48] sm:$0xff] }
 0x284   : > { %v2050_v23 = vpop.eup %2049  ;;  %2061 = vpow2.f32 %v820_v32  ;;  %v975_v14 = vmul.f32 %v2627_v52, %v959_v39 }
 0x285   : > { %1004 = vadd.xlane.f32.xlu1 %v2048_v30  ;;  %1002 = vadd.xlane.f32.xlu0 %v2050_v23  ;;  %v1164_v57 = vpack.c.bf16 %v2048_v30, %v2050_v23  ;;  %v2052_v29 = vpop.eup %2051  ;;  %v2677_v10 = vpop.permute.xlu1 %1075  ;;  %v955_v30 = vld [vmem:[#allocation3 + $0x28] sm:$0xff] }
 0x286   : > { %v2679_v61 = vpop.permute.xlu0 %1090  ;;  %v971_v51 = vmul.f32 %v2605_v38, %v955_v30  ;;  %v974_v38 = vmul.f32 %v2637_v54, %v958_v40  ;;  %v963_v54 = vld [vmem:[#allocation3 + $0x68] sm:$0xff] }
 0x287   : > { %1898 = vmatmul.mubr.bf16.gmra.mrb[8].mxu1 %v1164_v57 }
 0x288   : > { %v2054_v12 = vpop.eup %2053 }
 0x289   : > { %1000 = vadd.xlane.f32.xlu1 %v2044_v55  ;;  %998 = vadd.xlane.f32.xlu0 %v2046_v3  ;;  %v1165_v47 = vpack.c.bf16 %v2052_v29, %v2054_v12  ;;  %v2056_v18 = vpop.eup %2055  ;;  %v2681_v44 = vpop.permute.xlu1 %1085 }
 0x28a   : > { %v2683_v58 = vpop.permute.xlu0 %1100 }
 0x28b   : > { %1901 = vmatprep.mubr.bf16.mxu1 %v1165_v47 }
 0x28c   : > { %v2058_v13 = vpop.eup %2057 }
 0x28d   : > { %1012 = vadd.xlane.f32.xlu1 %v2056_v18  ;;  %1010 = vadd.xlane.f32.xlu0 %v2058_v13  ;;  %v1166_v37 = vpack.c.bf16 %v2056_v18, %v2058_v13  ;;  %v2665_v41 = vpop.eup %2059  ;;  %v2685_v60 = vpop.permute.xlu1 %1095 }
 0x28e   : > { %v2668_v5 = vpop.eup %2061  ;;  %v2687_v63 = vpop.permute.xlu0 %1120 }
 0x28f   : > { %1902 = vmatmul.mubr.bf16.gmra.mrb[12].mxu1 %v1166_v37 }
 0x291   : > { %1008 = vadd.xlane.f32.xlu1 %v2052_v29  ;;  %1006 = vadd.xlane.f32.xlu0 %v2054_v12  ;;  %v2689_v16 = vpop.permute.xlu1 %1115  ;;  %v960_v29 = vld [vmem:[#allocation3 + $0x50] sm:$0xff]  ;;  %v961_v12 = vld [vmem:[#allocation3 + $0x58] sm:$0xff] }
 0x292   : > { %v2691_v0 = vpop.permute.xlu0 %1110  ;;  %v976_v21 = vmul.f32 %v2631_v42, %v960_v29  ;;  %v977_v18 = vmul.f32 %v2621_v26, %v961_v12  ;;  %v965_v42 = vld [vmem:[#allocation3 + $0x78] sm:$0xff] }
 0x293   : > { %v981_v31 = vmul.f32 %v2668_v5, %v965_v42 }
 0x295   : > { %v2693_v1 = vpop.permute.xlu1 %1105 }
 0x296   : > { %v2695_v4 = vpop.permute.xlu0 %1130 }
 0x299   : > { %v2697_v7 = vpop.permute.xlu1 %1125 }
 0x2a2   : > { %1135 = vperm.xlu1 %1974, %v2665_v41  }
 0x2a7   : > { %1140 = vperm.xlu0 %1973, %v2668_v5   ;;  %v1049_v5 = vld [vmem:[#allocation4 + $0x10] sm:$0xff] }
 0x2f1   : > { %v987_v2 = vpop.xlane.xlu0 %986 }
 0x2f2   : > { %v1016_v15 = vadd.f32 %v987_v2, %v968_v8  ;;  %v983_v19 = vpop.xlane.xlu1 %982 }
 0x2f3   : > { %v1014_v20 = vadd.f32 %v983_v19, %v966_v17  ;;  %v964_v17 = vld [vmem:[#allocation3 + $0x70] sm:$0xff] }
 0x2f4   : > { %1033 = vst.msk [vmem:[#allocation3 + $0x10] sm:$0xff] %vm1030_vm4, %v1016_v15  ;;  %v980_v19 = vmul.f32 %v2665_v41, %v964_v17 }
 0x2f5   : > { %1031 = vst.msk [vmem:[#allocation3] sm:$0xff] %vm1030_vm4, %v1014_v20 }
 0x2f6   : > { %v989_v24 = vpop.xlane.xlu1 %988 }
 0x2f7   : > { %v1017_v48 = vadd.f32 %v989_v24, %v969_v22 }
 0x2f9   : > { %1034 = vst.msk [vmem:[#allocation3 + $0x18] sm:$0xff] %vm1030_vm4, %v1017_v48  ;;  %v985_v27 = vpop.xlane.xlu0 %984  ;;  %v978_v48 = vmul.f32 %v2640_v62, %v962_v28 }
 0x2fa   : > { %v1015_v49 = vadd.f32 %v985_v27, %v967_v33  ;;  %v979_v33 = vmul.f32 %v2633_v53, %v963_v54  ;;  %v1059_v54 = vld [vmem:[#allocation4 + $0x60] sm:$0xff] }
 0x2fc   : > { %1032 = vst.msk [vmem:[#allocation3 + $0x8] sm:$0xff] %vm1030_vm4, %v1015_v49 }
 0x2fe   : > { %v995_v50 = vpop.xlane.xlu0 %994 }
 0x2ff   : > { %v1020_v11 = vadd.f32 %v995_v50, %v972_v6  ;;  %v1047_v6 = vld [vmem:[#allocation4] sm:$0xff]  ;;  %v1050_v50 = vld [vmem:[#allocation4 + $0x18] sm:$0xff] }
 0x300   : > { %v1146_v62 = vmul.f32 %v2675_v59, %v1050_v50  ;;  %v1054_v59 = vld [vmem:[#allocation4 + $0x38] sm:$0xff] }
 0x301   : > { %1037 = vst.msk [vmem:[#allocation3 + $0x30] sm:$0xff] %vm1030_vm4, %v1020_v11  ;;  %v1145_v11 = vmul.f32 %v2677_v10, %v1049_v5  ;;  %v1051_v10 = vld [vmem:[#allocation4 + $0x20] sm:$0xff] }
 0x302   : > { %v991_v55 = vpop.xlane.xlu0 %990  ;;  %v1147_v45 = vmul.f32 %v2681_v44, %v1051_v10  ;;  %v1058_v44 = vld [vmem:[#allocation4 + $0x58] sm:$0xff] }
 0x303   : > { %v1018_v3 = vadd.f32 %v991_v55, %v970_v25  ;;  %v1143_v25 = vmul.f32 %v2671_v43, %v1047_v6  ;;  %v1053_v43 = vld [vmem:[#allocation4 + $0x30] sm:$0xff] }
 0x304   : > { %v1149_v29 = vmul.f32 %v2685_v60, %v1053_v43  ;;  %v1055_v60 = vld [vmem:[#allocation4 + $0x40] sm:$0xff] }
 0x305   : > { %1035 = vst.msk [vmem:[#allocation3 + $0x20] sm:$0xff] %vm1030_vm4, %v1018_v3 }
 0x30a   : > { %v997_v9 = vpop.xlane.xlu1 %996 }
 0x30b   : > { %v1021_v23 = vadd.f32 %v997_v9, %v973_v46 }
 0x30d   : > { %1038 = vst.msk [vmem:[#allocation3 + $0x38] sm:$0xff] %vm1030_vm4, %v1021_v23 }
 0x30e   : > { %v993_v57 = vpop.xlane.xlu1 %992 }
 0x30f   : > { %v1019_v47 = vadd.f32 %v993_v57, %v971_v51  ;;  %v1052_v57 = vld [vmem:[#allocation4 + $0x28] sm:$0xff] }
 0x311   : > { %1036 = vst.msk [vmem:[#allocation3 + $0x28] sm:$0xff] %vm1030_vm4, %v1019_v47  ;;  %v1150_v47 = vmul.f32 %v2683_v58, %v1054_v59  ;;  %v1056_v58 = vld [vmem:[#allocation4 + $0x48] sm:$0xff] }
 0x312   : > { %v1003_v13 = vpop.xlane.xlu0 %1002  ;;  %v1005_v37 = vpop.xlane.xlu1 %1004 }
 0x313   : > { %v1024_v32 = vadd.f32 %v1003_v13, %v976_v21  ;;  %v1025_v36 = vadd.f32 %v1005_v37, %v977_v18  ;;  %v1148_v13 = vmul.f32 %v2679_v61, %v1052_v57  ;;  %v1151_v61 = vmul.f32 %v2693_v1, %v1055_v60  ;;  %v1062_v1 = vld [vmem:[#allocation4 + $0x78] sm:$0xff] }
 0x315   : > { %1041 = vst.msk [vmem:[#allocation3 + $0x50] sm:$0xff] %vm1030_vm4, %v1024_v32  ;;  %1042 = vst.msk [vmem:[#allocation3 + $0x58] sm:$0xff] %vm1030_vm4, %v1025_v36  ;;  %v1057_v36 = vld [vmem:[#allocation4 + $0x50] sm:$0xff] }
 0x316   : > { %v999_v8 = vpop.xlane.xlu0 %998  ;;  %v1001_v2 = vpop.xlane.xlu1 %1000 }
 0x317   : > { %v1022_v15 = vadd.f32 %v999_v8, %v974_v38  ;;  %v1023_v26 = vadd.f32 %v1001_v2, %v975_v14  ;;  %v1153_v14 = vmul.f32 %v2689_v16, %v1057_v36  ;;  %v1154_v2 = vmul.f32 %v2687_v63, %v1058_v44 }
 0x319   : > { %1039 = vst.msk [vmem:[#allocation3 + $0x40] sm:$0xff] %vm1030_vm4, %v1022_v15  ;;  %1040 = vst.msk [vmem:[#allocation3 + $0x48] sm:$0xff] %vm1030_vm4, %v1023_v26  ;;  %v1152_v15 = vmul.f32 %v2691_v0, %v1056_v58 }
 0x31a   : > { %v1011_v20 = vpop.xlane.xlu0 %1010  ;;  %v1013_v22 = vpop.xlane.xlu1 %1012 }
 0x31b   : > { %v1028_v24 = vadd.f32 %v1011_v20, %v980_v19  ;;  %v1029_v52 = vadd.f32 %v1013_v22, %v981_v31  ;;  %v1061_v22 = vld [vmem:[#allocation4 + $0x70] sm:$0xff] }
 0x31d   : > { %1045 = vst.msk [vmem:[#allocation3 + $0x70] sm:$0xff] %vm1030_vm4, %v1028_v24  ;;  %1046 = vst.msk [vmem:[#allocation3 + $0x78] sm:$0xff] %vm1030_vm4, %v1029_v52  ;;  %v1060_v24 = vld [vmem:[#allocation4 + $0x68] sm:$0xff]  ;;  %v1155_v52 = vmul.f32 %v2697_v7, %v1059_v54 }
 0x31e   : > { %v1007_v27 = vpop.xlane.xlu0 %1006  ;;  %v1009_v49 = vpop.xlane.xlu1 %1008 }
 0x31f   : > { %v1026_v56 = vadd.f32 %v1007_v27, %v978_v48  ;;  %v1027_v41 = vadd.f32 %v1009_v49, %v979_v33 }
 0x321   : > { %1043 = vst.msk [vmem:[#allocation3 + $0x60] sm:$0xff] %vm1030_vm4, %v1026_v56  ;;  %1044 = vst.msk [vmem:[#allocation3 + $0x68] sm:$0xff] %vm1030_vm4, %v1027_v41  ;;  %v1156_v56 = vmul.f32 %v2695_v4, %v1060_v24 }
 0x322   : > { %v1136_v28 = vpop.permute.xlu1 %1135 }
 0x323   : > { %v1157_v0 = vmul.f32 %v1136_v28, %v1061_v22 }
 0x326   : > { %v1141_v63 = vpop.permute.xlu0 %1140 }
 0x327   : > { %v1158_v33 = vmul.f32 %v1141_v63, %v1062_v1 }
 0x342   : > { %v1891_v55 = vpop.f32.mrb[0].mxu1 }
 0x343   : > { %v1314_v53 = vadd.f32 %v1891_v55, %v1145_v11  ;;  %v1249_v3 = vpop.f32.mrb[1].mxu1 }
 0x344   : > { %v1312_v46 = vadd.f32 %v1249_v3, %v1143_v25  ;;  %v1892_v9 = vpop.f32.mrb[2].mxu1 }
 0x345   : > { %1330 = vst.msk [vmem:[#allocation4 + $0x10] sm:$0xff] %vm476_vm2, %v1314_v53  ;;  %v1315_v30 = vadd.f32 %v1892_v9, %v1146_v62  ;;  %v1252_v23 = vpop.f32.mrb[3].mxu1 }
 0x346   : > { %1328 = vst.msk [vmem:[#allocation4] sm:$0xff] %vm476_vm2, %v1312_v46  ;;  %v1313_v51 = vadd.f32 %v1252_v23, %v1144_v35 }
 0x347   : > { %1331 = vst.msk [vmem:[#allocation4 + $0x18] sm:$0xff] %vm476_vm2, %v1315_v30 }
 0x348   : > { %1329 = vst.msk [vmem:[#allocation4 + $0x8] sm:$0xff] %vm476_vm2, %v1313_v51 }
 0x352   : > { %v1895_v12 = vpop.f32.mrb[4].mxu1 }
 0x353   : > { %v1318_v21 = vadd.f32 %v1895_v12, %v1149_v29  ;;  %v1265_v18 = vpop.f32.mrb[5].mxu1 }
 0x354   : > { %v1316_v37 = vadd.f32 %v1265_v18, %v1147_v45  ;;  %v1896_v40 = vpop.f32.mrb[6].mxu1 }
 0x355   : > { %1334 = vst.msk [vmem:[#allocation4 + $0x30] sm:$0xff] %vm476_vm2, %v1318_v21  ;;  %v1319_v39 = vadd.f32 %v1896_v40, %v1150_v47  ;;  %v1268_v32 = vpop.f32.mrb[7].mxu1 }
 0x356   : > { %1332 = vst.msk [vmem:[#allocation4 + $0x20] sm:$0xff] %vm476_vm2, %v1316_v37  ;;  %v1317_v38 = vadd.f32 %v1268_v32, %v1148_v13 }
 0x357   : > { %1335 = vst.msk [vmem:[#allocation4 + $0x38] sm:$0xff] %vm476_vm2, %v1319_v39 }
 0x358   : > { %1333 = vst.msk [vmem:[#allocation4 + $0x28] sm:$0xff] %vm476_vm2, %v1317_v38 }
 0x35a   : > { %v1899_v8 = vpop.f32.mrb[8].mxu1 }
 0x35b   : > { %v1322_v17 = vadd.f32 %v1899_v8, %v1153_v14  ;;  %v1281_v42 = vpop.f32.mrb[9].mxu1 }
 0x35c   : > { %v1320_v26 = vadd.f32 %v1281_v42, %v1151_v61  ;;  %v1900_v19 = vpop.f32.mrb[10].mxu1 }
 0x35d   : > { %1338 = vst.msk [vmem:[#allocation4 + $0x50] sm:$0xff] %vm476_vm2, %v1322_v17  ;;  %v1323_v31 = vadd.f32 %v1900_v19, %v1154_v2  ;;  %v1284_v20 = vpop.f32.mrb[11].mxu1 }
 0x35e   : > { %1336 = vst.msk [vmem:[#allocation4 + $0x40] sm:$0xff] %vm476_vm2, %v1320_v26  ;;  %v1321_v16 = vadd.f32 %v1284_v20, %v1152_v15 }
 0x35f   : > { %1339 = vst.msk [vmem:[#allocation4 + $0x58] sm:$0xff] %vm476_vm2, %v1323_v31 }
 0x360   : > { %1337 = vst.msk [vmem:[#allocation4 + $0x48] sm:$0xff] %vm476_vm2, %v1321_v16 }
 0x362   : > { %v1903_v48 = vpop.f32.mrb[12].mxu1 }
 0x363   : > { %v1326_v27 = vadd.f32 %v1903_v48, %v1157_v0  ;;  %v1297_v49 = vpop.f32.mrb[13].mxu1 }
 0x364   : > { %v1324_v41 = vadd.f32 %v1297_v49, %v1155_v52  ;;  %v1904_v5 = vpop.f32.mrb[14].mxu1 }
 0x365   : > { %1342 = vst.msk [vmem:[#allocation4 + $0x70] sm:$0xff] %vm476_vm2, %v1326_v27  ;;  %v1327_v6 = vadd.f32 %v1904_v5, %v1158_v33  ;;  %v1300_v50 = vpop.f32.mrb[15].mxu1 }
 0x366   : > { %1340 = vst.msk [vmem:[#allocation4 + $0x60] sm:$0xff] %vm476_vm2, %v1324_v41  ;;  %v1325_v34 = vadd.f32 %v1300_v50, %v1156_v56 }
 0x367   : > { %1343 = vst.msk [vmem:[#allocation4 + $0x78] sm:$0xff] %vm476_vm2, %v1327_v6 }
 0x368   : > { %1341 = vst.msk [vmem:[#allocation4 + $0x68] sm:$0xff] %vm476_vm2, %v1325_v34 }
 0x369 PF: > { %p1774_p11 = scmp.ne.s32.totalorder %s2127_s12, 1 }
 0x36a   : > { %v1366_v7 = vld [vmem:[#allocation3 + $0x10] sm:$0xff] (!%p1774_p11)  ;;  %v1364_v11 = vld [vmem:[#allocation3] sm:$0xff] (!%p1774_p11)  ;;  %v1367_v4 = vld [vmem:[#allocation3 + $0x18] sm:$0xff] (!%p1774_p11)  ;;  %v2156_v25 = vmov (!%p1774_p11), 0   ;;  %vm1572_vm2 = vcmask (!%p1774_p11), 257024  }
 0x36b   : > { %1363 = sbr.rel (%p1774_p11) target bundleno = 1048 (0x418), region = 44  ;;  %2064 = vset.pattern.permute.xlu1 (!%p1774_p11), %v2156_v25  ;;  %2063 = vset.pattern.permute.xlu0 (!%p1774_p11), %v2156_v25  ;;  %2065 = vrcp.f32 (!%p1774_p11), %v1366_v7  ;;  %v1365_v55 = vld [vmem:[#allocation3 + $0x8] sm:$0xff] (!%p1774_p11)  ;;  %v1368_v53 = vld [vmem:[#allocation3 + $0x20] sm:$0xff] (!%p1774_p11)  ;;  %v1371_v3 = vld [vmem:[#allocation3 + $0x38] sm:$0xff] (!%p1774_p11) }
 0x36c   : > { %2067 = vrcp.f32 (!%p1774_p11), %v1364_v11  ;;  %v1369_v62 = vld [vmem:[#allocation3 + $0x28] sm:$0xff] (!%p1774_p11)  ;;  %v1370_v35 = vld [vmem:[#allocation3 + $0x30] sm:$0xff] (!%p1774_p11)  ;;  %v1372_v51 = vld [vmem:[#allocation3 + $0x40] sm:$0xff] (!%p1774_p11) }
 0x36d   : > { %2069 = vrcp.f32 (!%p1774_p11), %v1367_v4  ;;  %v1373_v30 = vld [vmem:[#allocation3 + $0x48] sm:$0xff] (!%p1774_p11)  ;;  %v1375_v10 = vld [vmem:[#allocation3 + $0x58] sm:$0xff] (!%p1774_p11)  ;;  %v1374_v57 = vld [vmem:[#allocation3 + $0x50] sm:$0xff] (!%p1774_p11) }
 0x36e   : > { %2071 = vrcp.f32 (!%p1774_p11), %v1365_v55  ;;  %v1377_v45 = vld [vmem:[#allocation3 + $0x68] sm:$0xff] (!%p1774_p11)  ;;  %v1376_v47 = vld [vmem:[#allocation3 + $0x60] sm:$0xff] (!%p1774_p11)  ;;  %v1379_v18 = vld [vmem:[#allocation3 + $0x78] sm:$0xff] (!%p1774_p11) }
 0x36f   : > { %2073 = vrcp.f32 (!%p1774_p11), %v1369_v62  ;;  %v1378_v37 = vld [vmem:[#allocation3 + $0x70] sm:$0xff] (!%p1774_p11)  ;;  %v1396_v14 = vld [vmem:[#allocation4] sm:$0xff] (!%p1774_p11)  ;;  %v1399_v42 = vld [vmem:[#allocation4 + $0x18] sm:$0xff] (!%p1774_p11) }
 0x370   : > { %2075 = vrcp.f32 (!%p1774_p11), %v1368_v53  ;;  %v1398_v58 = vld [vmem:[#allocation4 + $0x10] sm:$0xff] (!%p1774_p11)  ;;  %v1397_v26 = vld [vmem:[#allocation4 + $0x8] sm:$0xff] (!%p1774_p11)  ;;  %v1400_v1 = vld [vmem:[#allocation4 + $0x20] sm:$0xff] (!%p1774_p11) }
 0x371   : > { %2077 = vrcp.f32 (!%p1774_p11), %v1371_v3  ;;  %v1401_v16 = vld [vmem:[#allocation4 + $0x28] sm:$0xff] (!%p1774_p11)  ;;  %v1403_v33 = vld [vmem:[#allocation4 + $0x38] sm:$0xff] (!%p1774_p11)  ;;  %v1402_v49 = vld [vmem:[#allocation4 + $0x30] sm:$0xff] (!%p1774_p11) }
 0x372   : > { %2079 = vrcp.f32 %v1370_v35  ;;  %v1405_v34 = vld [vmem:[#allocation4 + $0x48] sm:$0xff]  ;;  %v1404_v11 = vld [vmem:[#allocation4 + $0x40] sm:$0xff]  ;;  %v1407_v3 = vld [vmem:[#allocation4 + $0x58] sm:$0xff] }
 0x373   : > { %2081 = vrcp.f32 %v1373_v30 }
 0x374   : > { %2083 = vrcp.f32 %v1372_v51 }
 0x375   : > { %v2066_v46 = vpop.eup %2065  ;;  %2085 = vrcp.f32 %v1375_v10  ;;  %v1409_v10 = vld [vmem:[#allocation4 + $0x68] sm:$0xff] }
 0x376   : > { %v2068_v9 = vpop.eup %2067  ;;  %1424 = vperm.xlu1 %2064, %v2066_v46   ;;  %2087 = vrcp.f32 %v1374_v57  ;;  %v1406_v46 = vld [vmem:[#allocation4 + $0x50] sm:$0xff]  ;;  %v1408_v57 = vld [vmem:[#allocation4 + $0x60] sm:$0xff] }
 0x377   : > { %v2070_v23 = vpop.eup %2069  ;;  %1414 = vperm.xlu0 %2063, %v2068_v9   ;;  %2089 = vrcp.f32 %v1377_v45 }
 0x378   : > { %v2072_v43 = vpop.eup %2071  ;;  %2091 = vrcp.f32 %v1376_v47 }
 0x379   : > { %v2074_v59 = vpop.eup %2073  ;;  %2093 = vrcp.f32 %v1379_v18  ;;  %v1411_v18 = vld [vmem:[#allocation4 + $0x78] sm:$0xff] }
 0x37a   : > { %1429 = vperm.xlu1 %2064, %v2070_v23   ;;  %v2076_v29 = vpop.eup %2075  ;;  %2095 = vrcp.f32 %v1378_v37  ;;  %v1410_v37 = vld [vmem:[#allocation4 + $0x70] sm:$0xff] }
 0x37b   : > { %1419 = vperm.xlu0 %2063, %v2072_v43   ;;  %v2078_v12 = vpop.eup %2077 }
 0x37c   : > { %v2080_v21 = vpop.eup %2079 }
 0x37d   : > { %v2082_v13 = vpop.eup %2081 }
 0x37e   : > { %1439 = vperm.xlu1 %2064, %v2074_v59   ;;  %v2084_v40 = vpop.eup %2083 }
 0x37f   : > { %1434 = vperm.xlu0 %2063, %v2076_v29   ;;  %v2086_v39 = vpop.eup %2085 }
 0x380   : > { %v2088_v32 = vpop.eup %2087 }
 0x381   : > { %v2090_v36 = vpop.eup %2089 }
 0x382   : > { %1449 = vperm.xlu1 %2064, %v2078_v12   ;;  %v2092_v38 = vpop.eup %2091 }
 0x383   : > { %1444 = vperm.xlu0 %2063, %v2080_v21   ;;  %v2094_v60 = vpop.eup %2093 }
 0x384   : > { %v2096_v44 = vpop.eup %2095 }
 0x386   : > { %1459 = vperm.xlu1 %2064, %v2082_v13  }
 0x387   : > { %1454 = vperm.xlu0 %2063, %v2084_v40  }
 0x38a   : > { %1469 = vperm.xlu1 %2064, %v2086_v39  }
 0x38b   : > { %1464 = vperm.xlu0 %2063, %v2088_v32  }
 0x38e   : > { %1479 = vperm.xlu1 %2064, %v2090_v36  }
 0x38f   : > { %1474 = vperm.xlu0 %2063, %v2092_v38  }
 0x392   : > { %1489 = vperm.xlu1 %2064, %v2094_v60  }
 0x393   : > { %1484 = vperm.xlu0 %2063, %v2096_v44  }
 0x3f5   : > { %v1425_v61 = vpop.permute.xlu1 %1424 }
 0x3f6   : > { %v1494_v8 = vmul.f32 %v1425_v61, %v1398_v58  ;;  %v1415_v2 = vpop.permute.xlu0 %1414 }
 0x3f7   : > { %v1492_v17 = vmul.f32 %v1415_v2, %v1396_v14 }
 0x3f8   : > { %v1795_v15 = vpack.c.bf16 %v1494_v8, %v1494_v8 }
 0x3f9   : > { %v1793_v19 = vpack.c.bf16 %v1492_v17, %v1492_v17  ;;  %v1430_v31 = vpop.permute.xlu1 %1429 }
 0x3fa   : > { %1575 = vst.msk [vmem:[%s2233_s5 + $0x8] sm:$0xf] %vm1572_vm2, %v1795_v15  ;;  %v1495_v20 = vmul.f32 %v1430_v31, %v1399_v42  ;;  %v1420_v22 = vpop.permute.xlu0 %1419 }
 0x3fb   : > { %1573 = vst.msk [vmem:[%s2233_s5] sm:$0xf] %vm1572_vm2, %v1793_v19  ;;  %v1493_v28 = vmul.f32 %v1420_v22, %v1397_v26 }
 0x3fc   : > { %v1796_v54 = vpack.c.bf16 %v1495_v20, %v1495_v20 }
 0x3fd   : > { %v1794_v63 = vpack.c.bf16 %v1493_v28, %v1493_v28  ;;  %v1440_v24 = vpop.permute.xlu1 %1439 }
 0x3fe   : > { %1576 = vst.msk [vmem:[%s2233_s5 + $0xc] sm:$0xf] %vm1572_vm2, %v1796_v54  ;;  %v1497_v0 = vmul.f32 %v1440_v24, %v1401_v16  ;;  %v1435_v52 = vpop.permute.xlu0 %1434 }
 0x3ff   : > { %1574 = vst.msk [vmem:[%s2233_s5 + $0x4] sm:$0xf] %vm1572_vm2, %v1794_v63  ;;  %v1496_v48 = vmul.f32 %v1435_v52, %v1400_v1 }
 0x400   : > { %v1798_v27 = vpack.c.bf16 %v1497_v0, %v1497_v0 }
 0x401   : > { %v1797_v56 = vpack.c.bf16 %v1496_v48, %v1496_v48  ;;  %v1450_v41 = vpop.permute.xlu1 %1449 }
 0x402   : > { %1578 = vst.msk [vmem:[%s2233_s5 + $0x14] sm:$0xf] %vm1572_vm2, %v1798_v27  ;;  %v1499_v5 = vmul.f32 %v1450_v41, %v1403_v33  ;;  %v1445_v6 = vpop.permute.xlu0 %1444 }
 0x403   : > { %1577 = vst.msk [vmem:[%s2233_s5 + $0x10] sm:$0xf] %vm1572_vm2, %v1797_v56  ;;  %v1498_v50 = vmul.f32 %v1445_v6, %v1402_v49 }
 0x404   : > { %v1800_v7 = vpack.c.bf16 %v1499_v5, %v1499_v5 }
 0x405   : > { %v1799_v4 = vpack.c.bf16 %v1498_v50, %v1498_v50  ;;  %v1460_v25 = vpop.permute.xlu1 %1459 }
 0x406   : > { %1580 = vst.msk [vmem:[%s2233_s5 + $0x1c] sm:$0xf] %vm1572_vm2, %v1800_v7  ;;  %v1501_v55 = vmul.f32 %v1460_v25, %v1405_v34  ;;  %v1455_v62 = vpop.permute.xlu0 %1454 }
 0x407   : > { %1579 = vst.msk [vmem:[%s2233_s5 + $0x18] sm:$0xf] %vm1572_vm2, %v1799_v4  ;;  %v1500_v53 = vmul.f32 %v1455_v62, %v1404_v11 }
 0x408   : > { %v1802_v35 = vpack.c.bf16 %v1501_v55, %v1501_v55 }
 0x409   : > { %v1801_v9 = vpack.c.bf16 %v1500_v53, %v1500_v53  ;;  %v1470_v30 = vpop.permute.xlu1 %1469 }
 0x40a   : > { %1582 = vst.msk [vmem:[%s2233_s5 + $0x24] sm:$0xf] %vm1572_vm2, %v1802_v35  ;;  %v1503_v23 = vmul.f32 %v1470_v30, %v1407_v3  ;;  %v1465_v51 = vpop.permute.xlu0 %1464 }
 0x40b   : > { %1581 = vst.msk [vmem:[%s2233_s5 + $0x20] sm:$0xf] %vm1572_vm2, %v1801_v9  ;;  %v1502_v43 = vmul.f32 %v1465_v51, %v1406_v46 }
 0x40c   : > { %v1804_v59 = vpack.c.bf16 %v1503_v23, %v1503_v23 }
 0x40d   : > { %v1803_v29 = vpack.c.bf16 %v1502_v43, %v1502_v43  ;;  %v1480_v45 = vpop.permute.xlu1 %1479 }
 0x40e   : > { %1584 = vst.msk [vmem:[%s2233_s5 + $0x2c] sm:$0xf] %vm1572_vm2, %v1804_v59  ;;  %v1505_v12 = vmul.f32 %v1480_v45, %v1409_v10  ;;  %v1475_v47 = vpop.permute.xlu0 %1474 }
 0x40f   : > { %1583 = vst.msk [vmem:[%s2233_s5 + $0x28] sm:$0xf] %vm1572_vm2, %v1803_v29  ;;  %v1504_v21 = vmul.f32 %v1475_v47, %v1408_v57 }
 0x410   : > { %v1806_v13 = vpack.c.bf16 %v1505_v12, %v1505_v12 }
 0x411   : > { %v1805_v40 = vpack.c.bf16 %v1504_v21, %v1504_v21  ;;  %v1490_v39 = vpop.permute.xlu1 %1489 }
 0x412   : > { %1586 = vst.msk [vmem:[%s2233_s5 + $0x34] sm:$0xf] %vm1572_vm2, %v1806_v13  ;;  %v1507_v32 = vmul.f32 %v1490_v39, %v1411_v18  ;;  %v1485_v36 = vpop.permute.xlu0 %1484 }
 0x413   : > { %1585 = vst.msk [vmem:[%s2233_s5 + $0x30] sm:$0xf] %vm1572_vm2, %v1805_v40  ;;  %v1506_v38 = vmul.f32 %v1485_v36, %v1410_v37 }
 0x414   : > { %v1808_v60 = vpack.c.bf16 %v1507_v32, %v1507_v32 }
 0x415   : > { %v1807_v44 = vpack.c.bf16 %v1506_v38, %v1506_v38 }
 0x416   : > { %1588 = vst.msk [vmem:[%s2233_s5 + $0x3c] sm:$0xf] %vm1572_vm2, %v1808_v60 }
 0x417   : > { %1587 = vst.msk [vmem:[%s2233_s5 + $0x38] sm:$0xf] %vm1572_vm2, %v1807_v44 }
 0x418 PF: > { %s13_s18 = sadd.s32 1, %s2151_s18   ;;  %s2819_s12 = smov %s2139_s15 }
 0x419   : > { %p10_p12 = scmp.ge.s32.totalorder %s13_s18, 34   ;;  %s2820_s13 = smov %s2143_s16 }
 0x41a   : > { %s2821_s14 = smov %s2147_s17  ;;  %s2822_s15 = smov %s2826_s19 }
 0x41b   : > { %s2823_s16 = smov %s2830_s20  ;;  %s2824_s17 = smov %s2834_s21 }
 0x41c   :  { %12 = sbr.rel (!%p10_p12) target bundleno = 4 (0x4), region = 80 }

// kernel: causal_self_attention_forward.5
= control target key start
LH: loop header
LB: loop body
LE: loop exit
PB: predicated region body
PF: predicated region fallthrough
CT: control target
= control target key end

     0   :  { %8 = vsyncpa [#allocation3], 0  ;;  %s897_s0 = inlined_call_operand.vmem [shape: bf16[512,128], index: 0, kind: input, shape index: {}]   ;;  %s898_s1 = inlined_call_operand.vmem [shape: bf16[128,128], index: 1, kind: input, shape index: {}]   ;;  %s899_s2 = inlined_call_operand.vmem [shape: f32[1,128], index: 2, kind: input, shape index: {}]   ;;  %s900_s3 = inlined_call_operand.hbm [shape: f32[512,128], index: 3, kind: output, shape index: {}]  }
   0x1   :  { %10 = vsyncpa [#allocation3 + $0x1], 0  ;;  %s735_s12 = smov 0   ;;  %s737_s13 = smov 0  }
   0x2   :  { %s739_s14 = smov 0   ;;  %s741_s15 = smov 0  }
   0x3 LB: > { %s756_s16 = sadd.s32 4294967295, %s710_s15   ;;  %s497_s17 = sadd.s32 4294967294, %s710_s15   ;;  %s710_s15 = sphi %s741_s15, %s906_s15   ;;  %s706_s14 = sphi %s739_s14, %s905_s14   ;;  %s702_s13 = sphi %s737_s13, %s904_s13   ;;  %s698_s12 = sphi %s735_s12, %s903_s12  }
   0x4   : > { %s760_s18 = sadd.s32 1, %s710_s15   ;;  %s91_s19 = sadd.s32 1, %s706_s14 }
   0x5   : > { %s88_s20 = ssub.s32 %s710_s15, %s760_s18  ;;  %p101_p0 = scmp.ne.s32.totalorder %s706_s14, %s702_s13 }
   0x6   : > { %p89_p1 = scmp.eq.s32.totalorder %s88_s20, 0  ;;  %p102_p2 = scmp.eq.s32.totalorder %s756_s16, 3 }
   0x7   : > { %p107_p3 = scmp.ne.s32.totalorder %s702_s13, %s698_s12  ;;  %p108_p4 = scmp.eq.s32.totalorder %s497_s17, 3 }
   0x8   : > { %s771_s21 = scalar_select %p89_p1, %s706_s14, %s91_s19  }
   0x9   : > { %p773_p5 = por %p102_p2, %p101_p0  ;;  %p777_p6 = por %p108_p4, %p107_p3 }
   0xa   : > { %p500_p7 = scmp.ge.s32.totalorder %s710_s15, 1  ;;  %p141_p8 = scmp.lt.s32.totalorder %s710_s15, 5 }
   0xc   : > { %p142_p9 = pnand %p500_p7, %p141_p8 }
   0xd   : > { %v632_v0 = vld [vmem:[%s898_s1] sm:$0xff] (!%p142_p9)   ;;  %s502_s26 = sshll.u32 (!%p142_p9), %s756_s16, 4  ;;  %v633_v1 = vld [vmem:[%s898_s1 + $0x8] sm:$0xff] (!%p142_p9)   ;;  %v634_v2 = vld [vmem:[%s898_s1 + $0x10] sm:$0xff] (!%p142_p9)   ;;  %s162_s27 = sand.u32 (!%p142_p9), 1, %s702_s13  }
   0xe   : > { %145 = sbr.rel (%p142_p9) target bundleno = 286 (0x11e), region = 32  ;;  %p166_p10 = scmp.lt.s32.totalorder (!%p142_p9), %s502_s26, 63  ;;  %543 = vmatprep.subr.bf16.mxu0 (!%p142_p9), %v632_v0  ;;  %575 = vmatprep.subr.bf16.mxu1 (!%p142_p9), %v632_v0  ;;  %v635_v3 = vld [vmem:[%s898_s1 + $0x18] sm:$0xff] (!%p142_p9)   ;;  %v636_v6 = vld [vmem:[%s898_s1 + $0x20] sm:$0xff] (!%p142_p9)   ;;  %v637_v7 = vld [vmem:[%s898_s1 + $0x28] sm:$0xff] (!%p142_p9)  }
   0xf   : > { %544 = vmatpush3.bf16.msra.mxu0 (!%p142_p9), %v632_v0  ;;  %583 = vmatpush3.bf16.msra.mxu1 (!%p142_p9), %v632_v0  ;;  %v638_v8 = vld [vmem:[%s898_s1 + $0x30] sm:$0xff] (!%p142_p9)   ;;  %v639_v9 = vld [vmem:[%s898_s1 + $0x38] sm:$0xff] (!%p142_p9)   ;;  %s501_s28 = sshll.u32 (!%p142_p9), %s162_s27, 7  ;;  %v504_v16 = vld [vmem:[%s899_s2] ss:$0 sm:$0xff] (!%p142_p9)  ;;  %s526_s5 = sshll.u32 (!%p142_p9), %s756_s16, 11 }
  0x10   : > { %545 = vmatprep.subr.bf16.mxu0 (!%p142_p9), %v633_v1  ;;  %576 = vmatprep.subr.bf16.mxu1 (!%p142_p9), %v633_v1  ;;  %s844_s8 = scalar_lea.hbm (!%p142_p9), %s900_s3, %s526_s5  ;;  %s856_s9 = scalar_lea.sflag (!%p142_p9), [#allocation3], %s162_s27 }
  0x11   : > { %s712_s11 = smov (!%p142_p9), [#allocation2]  }
  0x12   : > { %s652_s17 = sshll.u32 (!%p142_p9), %s712_s11, 4  ;;  %s653_s17 = int_to_ptr.vmem [resolvable:$false] %s652_s17 }
  0x13   : > { %546 = vmatpush3.bf16.msra.mxu0 (!%p142_p9), %v633_v1  ;;  %584 = vmatpush3.bf16.msra.mxu1 (!%p142_p9), %v633_v1  ;;  %s654_s19 = scalar_lea.vmem (!%p142_p9), %s653_s17, 4096 }
  0x14   : > { %547 = vmatprep.subr.bf16.mxu0 (!%p142_p9), %v634_v2  ;;  %577 = vmatprep.subr.bf16.mxu1 (!%p142_p9), %v634_v2 }
  0x15   : > { %s908_s26 = smov (!%p166_p10, %s502_s26), 63 }
  0x16   : > { %s503_s4 = sshll.u32 %s908_s26, 2 }
  0x17   : > { %s796_s7 = scalar_lea.vmem %s897_s0, %s503_s4  ;;  %548 = vmatpush3.bf16.msra.mxu0 %v634_v2  ;;  %585 = vmatpush3.bf16.msra.mxu1 %v634_v2  ;;  %s827_s4 = scalar_lea.vmem [#allocation2], %s501_s28 }
  0x18   : > { %v640_v4 = vld [vmem:[%s796_s7] sm:$0xff]   ;;  %549 = vmatprep.subr.bf16.mxu0 %v635_v3  ;;  %578 = vmatprep.subr.bf16.mxu1 %v635_v3  ;;  %v642_v10 = vld [vmem:[%s796_s7 + $0x8] sm:$0xff]   ;;  %v644_v12 = vld [vmem:[%s796_s7 + $0x10] sm:$0xff]   ;;  %s435_s6 = sshll.u32 %s827_s4, 4  ;;  %s846_s6 = int_to_ptr.vmem [resolvable:$true] %s435_s6 }
  0x19   : > { %v641_v5 = vld [vmem:[%s796_s7 + $0x20] sm:$0xff]   ;;  %559 = vmatprep.mubr.bf16.mxu0 %v640_v4  ;;  %v643_v11 = vld [vmem:[%s796_s7 + $0x28] sm:$0xff]   ;;  %v645_v13 = vld [vmem:[%s796_s7 + $0x30] sm:$0xff]   ;;  %s648_s10 = scalar_lea.vmem %s846_s6, 2048  ;;  %p655_p0 = scmp.lt.s32.totalorder %s846_s6, %s653_s17 }
  0x1a   : > { %567 = vmatprep.mubr.bf16.mxu1 %v641_v5  ;;  %v646_v14 = vld [vmem:[%s796_s7 + $0x18] sm:$0xff]   ;;  %p649_p11 = scmp.ne.s32.totalorder %s846_s6, %s648_s10  ;;  %p656_p1 = scmp.lt.s32.totalorder %s654_s19, %s648_s10 }
  0x1b   : > { %550 = vmatpush3.bf16.msra.mxu0 %v635_v3  ;;  %586 = vmatpush3.bf16.msra.mxu1 %v635_v3  ;;  %v647_v15 = vld [vmem:[%s796_s7 + $0x38] sm:$0xff]  }
  0x1c   : > { %551 = vmatprep.subr.bf16.mxu0 %v636_v6  ;;  %579 = vmatprep.subr.bf16.mxu1 %v636_v6  ;;  %p650_p12 = pnand %p649_p11, %p773_p5  ;;  %p657_p2 = por %p656_p1, %p655_p0 }
  0x1e   : > { %p651_p13 = pneg %p650_p12 }
  0x1f   : > { %552 = vmatpush3.bf16.msra.mxu0 %v636_v6  ;;  %587 = vmatpush3.bf16.msra.mxu1 %v636_v6 }
  0x20   : > { %553 = vmatprep.subr.bf16.mxu0 %v637_v7  ;;  %580 = vmatprep.subr.bf16.mxu1 %v637_v7  ;;  %p658_p3 = pnand %p657_p2, %p651_p13 }
  0x23   : > { %554 = vmatpush3.bf16.msra.mxu0 %v637_v7  ;;  %588 = vmatpush3.bf16.msra.mxu1 %v637_v7 }
  0x24   : > { %555 = vmatprep.subr.bf16.mxu0 %v638_v8  ;;  %581 = vmatprep.subr.bf16.mxu1 %v638_v8 }
  0x27   : > { %556 = vmatpush3.bf16.msra.mxu0 %v638_v8  ;;  %589 = vmatpush3.bf16.msra.mxu1 %v638_v8 }
  0x28   : > { %557 = vmatprep.subr.bf16.mxu0 %v639_v9  ;;  %582 = vmatprep.subr.bf16.mxu1 %v639_v9 }
  0x2b   : > { %558 = vmatpush3.bf16.msra.mxu0 %v639_v9  ;;  %590 = vmatpush3.bf16.msra.mxu1 %v639_v9 }
  0x2e   : > { %560 = vmatmul.mubr.bf16.vlgmr.msra.gmra.mrb[0].mxu0 %v642_v10  ;;  %568 = vmatmul.mubr.bf16.vlgmr.msra.gmra.mrb[0].mxu1 %v643_v11 }
  0x2f   : > { %563 = vmatprep.mubr.bf16.mxu0 %v644_v12  ;;  %571 = vmatprep.mubr.bf16.mxu1 %v645_v13 }
  0x36   : > { %564 = vmatmul.mubr.bf16.gmra.mrb[4].mxu0 %v646_v14  ;;  %572 = vmatmul.mubr.bf16.gmra.mrb[4].mxu1 %v647_v15 }
 0x101   : > { %v561_v17 = vpop.f32.mrb[0].mxu0  ;;  %v569_v18 = vpop.f32.mrb[0].mxu1 }
 0x102   : > { %v351_v19 = vadd.f32 %v561_v17, %v504_v16  ;;  %v383_v20 = vadd.f32 %v569_v18, %v504_v16  ;;  %v342_v21 = vpop.f32.mrb[1].mxu0  ;;  %v374_v22 = vpop.f32.mrb[1].mxu1 }
 0x103   : > { %v343_v23 = vadd.f32 %v504_v16, %v342_v21  ;;  %v375_v24 = vadd.f32 %v504_v16, %v374_v22  ;;  %v562_v25 = vpop.f32.mrb[2].mxu0  ;;  %v570_v26 = vpop.f32.mrb[2].mxu1 }
 0x104   : > { %407 = vst [vmem:[%s827_s4 + $0x10] sm:$0xff] %v351_v19  ;;  %415 = vst [vmem:[%s827_s4 + $0x50] sm:$0xff] %v383_v20  ;;  %v354_v27 = vadd.f32 %v562_v25, %v504_v16  ;;  %v386_v28 = vadd.f32 %v570_v26, %v504_v16  ;;  %v345_v29 = vpop.f32.mrb[3].mxu0  ;;  %v377_v30 = vpop.f32.mrb[3].mxu1 }
 0x105   : > { %405 = vst [vmem:[%s827_s4] sm:$0xff] %v343_v23  ;;  %413 = vst [vmem:[%s827_s4 + $0x40] sm:$0xff] %v375_v24  ;;  %v346_v31 = vadd.f32 %v504_v16, %v345_v29  ;;  %v378_v32 = vadd.f32 %v504_v16, %v377_v30 }
 0x106   : > { %408 = vst [vmem:[%s827_s4 + $0x18] sm:$0xff] %v354_v27  ;;  %416 = vst [vmem:[%s827_s4 + $0x58] sm:$0xff] %v386_v28 }
 0x107   : > { %406 = vst [vmem:[%s827_s4 + $0x8] sm:$0xff] %v346_v31  ;;  %414 = vst [vmem:[%s827_s4 + $0x48] sm:$0xff] %v378_v32 }
 0x109   : > { %v565_v33 = vpop.f32.mrb[4].mxu0  ;;  %v573_v34 = vpop.f32.mrb[4].mxu1 }
 0x10a   : > { %v367_v35 = vadd.f32 %v565_v33, %v504_v16  ;;  %v399_v36 = vadd.f32 %v573_v34, %v504_v16  ;;  %v358_v37 = vpop.f32.mrb[5].mxu0  ;;  %v390_v38 = vpop.f32.mrb[5].mxu1 }
 0x10b   : > { %v359_v39 = vadd.f32 %v504_v16, %v358_v37  ;;  %v391_v40 = vadd.f32 %v504_v16, %v390_v38  ;;  %v566_v41 = vpop.f32.mrb[6].mxu0  ;;  %v574_v42 = vpop.f32.mrb[6].mxu1 }
 0x10c   : > { %411 = vst [vmem:[%s827_s4 + $0x30] sm:$0xff] %v367_v35  ;;  %419 = vst [vmem:[%s827_s4 + $0x70] sm:$0xff] %v399_v36  ;;  %v370_v43 = vadd.f32 %v566_v41, %v504_v16  ;;  %v402_v44 = vadd.f32 %v574_v42, %v504_v16  ;;  %v361_v45 = vpop.f32.mrb[7].mxu0  ;;  %v393_v46 = vpop.f32.mrb[7].mxu1 }
 0x10d   : > { %409 = vst [vmem:[%s827_s4 + $0x20] sm:$0xff] %v359_v39  ;;  %417 = vst [vmem:[%s827_s4 + $0x60] sm:$0xff] %v391_v40  ;;  %v362_v47 = vadd.f32 %v504_v16, %v361_v45  ;;  %v394_v48 = vadd.f32 %v504_v16, %v393_v46 }
 0x10e   : > { %412 = vst [vmem:[%s827_s4 + $0x38] sm:$0xff] %v370_v43  ;;  %420 = vst [vmem:[%s827_s4 + $0x78] sm:$0xff] %v402_v44 }
 0x10f   : > { %410 = vst [vmem:[%s827_s4 + $0x28] sm:$0xff] %v362_v47  ;;  %418 = vst [vmem:[%s827_s4 + $0x68] sm:$0xff] %v394_v48 }
 0x110   : > { %661 = shalt.err (!%p658_p3)
}
 0x111   : > { %s662_s20 = scalar_lea.hbm %s844_s8, 2048  ;;  %s666_s26 = scalar_lea.hbm %s900_s3, 8192 }
 0x112   : > { %p663_p4 = scmp.ne.s32.totalorder %s844_s8, %s662_s20  ;;  %p667_p9 = scmp.lt.u32.totalorder %s844_s8, %s900_s3 }
 0x113   : > { %p668_p10 = scmp.lt.u32.totalorder %s666_s26, %s662_s20  ;;  %p670_p12 = scmp.lt.u32.totalorder %s662_s20, %s844_s8 }
 0x114   : > { %p664_p7 = pnand %p663_p4, %p773_p5 }
 0x115   : > { %p669_p11 = por %p668_p10, %p667_p9 }
 0x116   : > { %p665_p8 = pneg %p664_p7 }
 0x117   : > { %p671_p13 = por %p670_p12, %p669_p11 }
 0x119   : > { %p672_p0 = pnand %p671_p13, %p665_p8 }
 0x11b   : > { %675 = shalt.err (!%p672_p0)
}
 0x11c   : > { %s713_s29 = smov 128   ;;  %s714_s30 = smov 8  }
 0x11d   : > { %591 = dma.vmem_to_hbm [thread:$0]  (%p773_p5), %s846_s6, 2048, %s844_s8, %s856_s9, %s713_s29, %s713_s29, %s714_s30  }
 0x11e PF: > { %p597_p1 = scmp.ge.s32.totalorder %s710_s15, 2  ;;  %s450_s4 = sand.u32 1, %s698_s12  }
 0x11f   : > { %s451_s5 = scalar_lea.sflag [#allocation3], %s450_s4 }
 0x120   : > { %p594_p2 = pnand %p597_p1, %p777_p6 }
 0x122   : > { %693 = dma.done.wait (!%p594_p2), %s451_s5, 2048  }
 0x123   : > { %695 = vsyncadd (!%p594_p2), %s451_s5, 4294965248  ;;  %p13_p3 = scmp.ge.s32.totalorder %s760_s18, 6   ;;  %s903_s12 = smov %s702_s13 }
 0x124   : > { %s904_s13 = smov %s706_s14  ;;  %s905_s14 = smov %s771_s21 }
 0x125   : > { %s906_s15 = smov %s760_s18  ;;  %15 = sbr.rel (!%p13_p3) target bundleno = 3 (0x3), region = 67 }
 0x12c   :  { %456 = vsyncpa [#allocation3], 1 }
 0x12d   :  { %458 = vsyncpa [#allocation3 + $0x1], 1 }

</bundles_post_ra>
